<compile_context>
chip_gen: v7x
topology: tpu7x:2x2x1
jax: 0.10.0
libtpu: 0.0.40
codegen_flags: <defaults>
</compile_context>

<pallas_src>
import jax
import jax.numpy as jnp
import numpy as np
from jax.experimental import pallas as pl
from jax.experimental.pallas import tpu as pltpu

f32 = jnp.float32
bf16 = jnp.bfloat16


def _lrelu(v):  # LeakyReLU(0.2) in f32
    return jnp.where(v >= 0, v, 0.2 * v)


def make_pfrb_kernel(NC, BF, TH, W):
    C = NC * BF
    CB = C + BF
    Wp = W + 2
    OH0 = TH + 2  # rows of x1/base computed per tile (1-row halo each side)

    def zero_wcols(ref):
        # Re-zero only the 1-px width border; all row interiors are rewritten below.
        rows, wp, ch = ref.shape
        z = jnp.zeros((rows, 1, ch), ref.dtype)
        ref[:, 0:1, :] = z
        ref[:, wp - 1:wp, :] = z

    def conv3x3(pad_ref, w_ref, oh):
        """3x3 conv as 9 shifted-window matmuls (bf16 operands, f32 accumulation).

        One width-shifted flat slab per kw (3 slabs/conv); each tap then takes a
        cheap contiguous row-offset slice of that slab instead of its own 2-D
        strided window slice.
        """
        ch_in = pad_ref.shape[-1]
        acc = None
        for kw in range(3):
            slab = pad_ref[:, kw:kw + W, :].reshape(-1, ch_in)   # [(oh+2)*W, ch_in]
            for kh in range(3):
                win = slab[kh * W:(kh + oh) * W, :]              # contiguous slice
                d = jnp.dot(win, w_ref[kh * 3 + kw], preferred_element_type=f32)
                acc = d if acc is None else acc + d
        return acc                                               # [oh*W, ch_out] f32

    def kernel(xprev_ref, xcur_ref, xnext_ref, w0_ref, b0_ref, w1_ref, b1_ref,
               w2_ref, b2_ref, out_ref, inpad, catpad):
        t = pl.program_id(1)
        nt = pl.num_programs(1)

        zero_wcols(inpad)
        zero_wcols(catpad)

        # ---- assemble the 2-row-halo'd, zero-bordered input tile in VMEM (bf16) ----
        # rows [0:2]   = halo from previous tile (or image-top zero padding)
        # rows [2:2+TH] = this tile's rows
        # rows [2+TH:]  = halo from next tile (or image-bottom zero padding)
        @pl.when(t == 0)
        def _():
            inpad[0:2, 1:1 + W, :] = jnp.zeros((2, W, C), bf16)

        @pl.when(t > 0)
        def _():
            inpad[0:2, 1:1 + W, :] = xprev_ref[0, TH - 2:TH, :, :].astype(bf16)

        inpad[2:2 + TH, 1:1 + W, :] = xcur_ref[0].astype(bf16)

        @pl.when(t == nt - 1)
        def _():
            inpad[2 + TH:4 + TH, 1:1 + W, :] = jnp.zeros((2, W, C), bf16)

        @pl.when(t < nt - 1)
        def _():
            inpad[2 + TH:4 + TH, 1:1 + W, :] = xnext_ref[0, 0:2, :, :].astype(bf16)

        # ---- conv0: per-stream 3x3, fused across streams (block-diag) + act ----
        x1 = _lrelu(conv3x3(inpad, w0_ref, OH0) + b0_ref[...])   # [OH0*W, C] f32
        x1_bf = x1.astype(bf16)

        # ---- conv1: 1x1 over the concatenated streams -> shared base ----
        # (uses the x1 value directly; no scratch re-read)
        base = _lrelu(jnp.dot(x1_bf, w1_ref[...], preferred_element_type=f32)
                      + b1_ref[...])                             # [OH0*W, BF] f32

        # ---- pack [x1 | base] so conv2 is a single K = C+BF contraction per tap ----
        cat = jnp.concatenate([x1_bf, base.astype(bf16)], axis=-1)   # [OH0*W, C+BF]
        catpad[:, 1:1 + W, :] = cat.reshape(OH0, W, CB)

        # conv2's vertical zero padding at the true image borders: halo rows that
        # fall outside the image must be zero, not conv0(zeros)+bias.
        @pl.when(t == 0)
        def _():
            catpad[0:1, :, :] = jnp.zeros((1, Wp, CB), bf16)

        @pl.when(t == nt - 1)
        def _():
            catpad[OH0 - 1:OH0, :, :] = jnp.zeros((1, Wp, CB), bf16)

        # ---- conv2: single fused 3x3 contraction + act + residual ----
        y = _lrelu(conv3x3(catpad, w2_ref, TH) + b2_ref[...])    # [TH*W, C] f32
        out_ref[0] = xcur_ref[0] + y.reshape(TH, W, C)           # residual in f32

    return kernel


def _fuse_params(NC, BF, w0, b0, w1, b1, w2, b2):
    """Stream-fused bf16 weights: block-diagonal conv0, merged [x1 | base] conv2."""
    C = NC * BF
    w0f = jnp.zeros((9, C, C), f32)
    w2f = jnp.zeros((9, C + BF, C), f32)        # input rows [0:C]=x1 (block-diag), [C:]=base
    for i in range(NC):
        s = slice(i * BF, (i + 1) * BF)
        w0f = w0f.at[:, s, s].set(w0[i])                 # conv0[i]
        w2f = w2f.at[:, s, s].set(w2[i, :, BF:, :])      # conv2[i], x1_i input rows
        w2f = w2f.at[:, C:, s].set(w2[i, :, :BF, :])     # conv2[i], base input rows
    return (w0f.astype(bf16), b0.reshape(1, C).astype(f32),
            w1.astype(bf16), b1.reshape(1, BF).astype(f32),
            w2f.astype(bf16), b2.reshape(1, C).astype(f32))


def _round_up(v, m):
    return ((v + m - 1) // m) * m


def _vmem_need_bytes(TH, W, C, BF):
    """Rough per-step VMEM need including lane/sublane layout padding."""
    Wp = W + 2
    Cp = _round_up(C, 128)
    CBp = _round_up(C + BF, 128)
    BFp = _round_up(BF, 128)
    W8 = _round_up(W, 8)
    Wp16 = _round_up(Wp, 16)                      # bf16 sublane tile
    blocks = 2 * 4 * TH * W8 * Cp * 4             # 3 input views + 1 output, double-buffered f32
    wbytes = (9 * _round_up(C, 16) * Cp + 9 * _round_up(C + BF, 16) * Cp
              + _round_up(C, 16) * BFp) * 2       # bf16 fused weights
    bbytes = (8 * Cp + 8 * BFp + 8 * Cp) * 4      # f32 biases (sublane-padded)
    weights = 2 * (wbytes + bbytes)
    scratch = 2 * ((TH + 4) * Wp16 * Cp + (TH + 2) * Wp16 * CBp)   # bf16 padded scratch
    temps = 6 * (TH + 2) * W8 * Cp * 4            # x1 / acc / slabs / cat / y live values
    return blocks + weights + scratch + temps


def _vmem_budget_bytes():
    cap = 128 << 20
    try:
        info = pltpu.get_tpu_info()
        cap = int(getattr(info, "vmem_capacity_bytes", cap) or cap)
    except Exception:
        pass
    if cap <= (64 << 20):     # v7x-class core: leave headroom for Mosaic internal scratch
        return 48 << 20
    return 100 << 20          # v5e / v6e (128 MiB physical)


def _pick_tile_h(H, W, C, BF, budget):
    best = None
    for d in range(2, H + 1):
        if H % d == 0 and _vmem_need_bytes(d, W, C, BF) <= budget:
            best = d
    if best is None:
        best = next((d for d in range(2, H + 1) if H % d == 0), H)
    return best


def pfrb_forward(x, w0, b0, w1, b1, w2, b2, tile_h=None):
    """x: [B, H, W, NC*BF] f32 (the nc streams concatenated on channels).

    w0: [NC, 9, BF, BF]   (tap = kh*3+kw, in, out)   b0: [NC, BF]
    w1: [NC*BF, BF]                                   b1: [BF]
    w2: [NC, 9, 2*BF, BF] (rows 0:BF = base, BF:2BF = x1_i)   b2: [NC, BF]
    Returns [B, H, W, NC*BF] f32.
    """
    B, H, W, C = x.shape
    NC = w0.shape[0]
    BF = C // NC
    assert C == NC * BF and H >= 2

    budget = _vmem_budget_bytes()
    TH = tile_h if tile_h is not None else _pick_tile_h(H, W, C, BF, budget)
    assert TH >= 2 and H % TH == 0, (TH, H)
    NT = H // TH

    w0f, b0f, w1f, b1f, w2f, b2f = _fuse_params(NC, BF, w0, b0, w1, b1, w2, b2)
    kernel = make_pfrb_kernel(NC, BF, TH, W)

    vmem_limit = int(min(max(int(1.25 * _vmem_need_bytes(TH, W, C, BF)), 32 << 20),
                         budget))

    def const_spec(a):
        nd = a.ndim
        return pl.BlockSpec(a.shape, lambda b, t, _nd=nd: (0,) * _nd)

    xblock = (1, TH, W, C)
    grid_spec = pltpu.PrefetchScalarGridSpec(
        num_scalar_prefetch=0,
        grid=(B, NT),
        in_specs=[
            # x is shipped three times (previous / current / next row tile) so every
            # H-tile gets its 2-row conv halo through plain auto-pipelined BlockSpecs.
            pl.BlockSpec(xblock, lambda b, t: (b, jnp.maximum(t - 1, 0), 0, 0)),
            pl.BlockSpec(xblock, lambda b, t: (b, t, 0, 0)),
            pl.BlockSpec(xblock, lambda b, t: (b, jnp.minimum(t + 1, NT - 1), 0, 0)),
            const_spec(w0f), const_spec(b0f),
            const_spec(w1f), const_spec(b1f),
            const_spec(w2f), const_spec(b2f),
        ],
        out_specs=pl.BlockSpec(xblock, lambda b, t: (b, t, 0, 0)),
        scratch_shapes=[
            pltpu.VMEM((TH + 4, W + 2, C), bf16),        # zero-bordered input (+2-row halo)
            pltpu.VMEM((TH + 2, W + 2, C + BF), bf16),   # zero-bordered [x1 | base]
        ],
    )

    return pl.pallas_call(
        kernel,
        out_shape=jax.ShapeDtypeStruct((B, H, W, C), f32),
        grid_spec=grid_spec,
        compiler_params=pltpu.CompilerParams(
            dimension_semantics=("parallel", "parallel"),   # tiles independent -> megacore
            vmem_limit_bytes=vmem_limit),
    )(x, x, x, w0f, b0f, w1f, b1f, w2f, b2f)


def pfrb_reference(x, w0, b0, w1, b1, w2, b2):
    """Pure-JAX f32 reference of PyTorch PFRB.forward (same channel-concat layout)."""
    B, H, W, C = x.shape
    NC = w0.shape[0]
    BF = C // NC

    def lrelu(v):
        return jnp.where(v >= 0, v, 0.2 * v)

    def conv3(inp, wtap, b):
        w = wtap.reshape(3, 3, wtap.shape[1], wtap.shape[2])
        y = jax.lax.conv_general_dilated(
            inp, w, (1, 1), ((1, 1), (1, 1)),
            dimension_numbers=('NHWC', 'HWIO', 'NHWC'))
        return y + b

    xs = [x[..., i * BF:(i + 1) * BF] for i in range(NC)]
    x1 = [lrelu(conv3(xs[i], w0[i], b0[i])) for i in range(NC)]
    merge = jnp.concatenate(x1, axis=-1)
    base = lrelu(jnp.einsum('bhwc,co->bhwo', merge, w1) + b1)
    x2 = [jnp.concatenate([base, x1[i]], axis=-1) for i in range(NC)]
    x2 = [lrelu(conv3(x2[i], w2[i], b2[i])) for i in range(NC)]
    return jnp.concatenate([xs[i] + x2[i] for i in range(NC)], axis=-1)


if __name__ == "__main__":
    B, NC, BF, H, W = 2, 3, 16, 8, 8
    C = NC * BF

    key = jax.random.PRNGKey(0)
    ks = jax.random.split(key, 7)

    # Synthetic parameters mirroring the nn.Module (HWIO, taps flattened kh*3+kw).
    x = jax.random.normal(ks[0], (B, H, W, C), jnp.float32)
    w0 = 0.1 * jax.random.normal(ks[1], (NC, 9, BF, BF), jnp.float32)
    b0 = 0.1 * jax.random.normal(ks[2], (NC, BF), jnp.float32)
    w1 = 0.1 * jax.random.normal(ks[3], (C, BF), jnp.float32)
    b1 = 0.1 * jax.random.normal(ks[4], (BF,), jnp.float32)
    w2 = 0.1 * jax.random.normal(ks[5], (NC, 9, 2 * BF, BF), jnp.float32)
    b2 = 0.1 * jax.random.normal(ks[6], (NC, BF), jnp.float32)

    fwd = jax.jit(pfrb_forward, static_argnames=("tile_h",))
    # tile_h=4 -> 2 H-tiles per image, so the halo-exchange path is exercised.
    out = jax.block_until_ready(fwd(x, w0, b0, w1, b1, w2, b2, tile_h=4))
    ref = jax.block_until_ready(pfrb_reference(x, w0, b0, w1, b1, w2, b2))

    # bf16 MXU operands (f32 accumulation) -> loosened tolerance vs the f32 reference.
    np.testing.assert_allclose(np.asarray(out), np.asarray(ref), rtol=5e-2, atol=5e-2)
    print("KERNEL_OK")
</pallas_src>

<mosaic_0001>
module attributes {stable_mosaic.version = 11 : i64} {
  func.func @kernel(%arg0: i32, %arg1: i32, %arg2: memref<1x4x8x48xf32, #tpu.memory_space<vmem>>, %arg3: memref<1x4x8x48xf32, #tpu.memory_space<vmem>>, %arg4: memref<1x4x8x48xf32, #tpu.memory_space<vmem>>, %arg5: memref<9x48x48xbf16, #tpu.memory_space<vmem>>, %arg6: memref<1x48xf32, #tpu.memory_space<vmem>>, %arg7: memref<48x16xbf16, #tpu.memory_space<vmem>>, %arg8: memref<1x16xf32, #tpu.memory_space<vmem>>, %arg9: memref<9x64x48xbf16, #tpu.memory_space<vmem>>, %arg10: memref<1x48xf32, #tpu.memory_space<vmem>>, %arg11: memref<1x4x8x48xf32, #tpu.memory_space<vmem>>, %arg12: memref<8x10x48xbf16, #tpu.memory_space<vmem>>, %arg13: memref<6x10x64xbf16, #tpu.memory_space<vmem>>) attributes {dimension_semantics = [#tpu.dimension_semantics<parallel>, #tpu.dimension_semantics<parallel>], iteration_bounds = array<i64: 2, 2>, scalar_prefetch = 0 : i64, scratch_operands = 2 : i64, tpu.core_type = #tpu.core_type<tc>, window_params = [{transform_indices = @transform_0, window_bounds = array<i64: 1, 4, 8, 48>}, {transform_indices = @transform_1, window_bounds = array<i64: 1, 4, 8, 48>}, {transform_indices = @transform_2, window_bounds = array<i64: 1, 4, 8, 48>}, {pipeline_mode = #tpu.pipeline_mode<synchronous>, transform_indices = @transform_3, window_bounds = array<i64: 9, 48, 48>}, {pipeline_mode = #tpu.pipeline_mode<synchronous>, transform_indices = @transform_4, window_bounds = array<i64: 1, 48>}, {pipeline_mode = #tpu.pipeline_mode<synchronous>, transform_indices = @transform_5, window_bounds = array<i64: 48, 16>}, {pipeline_mode = #tpu.pipeline_mode<synchronous>, transform_indices = @transform_6, window_bounds = array<i64: 1, 16>}, {pipeline_mode = #tpu.pipeline_mode<synchronous>, transform_indices = @transform_7, window_bounds = array<i64: 9, 64, 48>}, {pipeline_mode = #tpu.pipeline_mode<synchronous>, transform_indices = @transform_8, window_bounds = array<i64: 1, 48>}, {transform_indices = @transform_9, window_bounds = array<i64: 1, 4, 8, 48>}]} {
    %cst = arith.constant 0.000000e+00 : bf16
    %0 = vector.broadcast %cst : bf16 to vector<8x1x48xbf16>
    %c0 = arith.constant 0 : index
    %c0_0 = arith.constant 0 : index
    %c0_1 = arith.constant 0 : index
    %1 = vector.load %arg12[%c0, %c0_0, %c0_1] : memref<8x10x48xbf16, #tpu.memory_space<vmem>>, vector<8x1x48xbf16>
    tpu.vector_store %arg12[%c0, %c0_0, %c0_1], %0 {strides = array<i32>} : memref<8x10x48xbf16, #tpu.memory_space<vmem>>, vector<8x1x48xbf16>,
    %c0_2 = arith.constant 0 : index
    %c9 = arith.constant 9 : index
    %c0_3 = arith.constant 0 : index
    %2 = vector.load %arg12[%c0_2, %c9, %c0_3] : memref<8x10x48xbf16, #tpu.memory_space<vmem>>, vector<8x1x48xbf16>
    tpu.vector_store %arg12[%c0_2, %c9, %c0_3], %0 {strides = array<i32>} : memref<8x10x48xbf16, #tpu.memory_space<vmem>>, vector<8x1x48xbf16>,
    %cst_4 = arith.constant 0.000000e+00 : bf16
    %3 = vector.broadcast %cst_4 : bf16 to vector<6x1x64xbf16>
    %c0_5 = arith.constant 0 : index
    %c0_6 = arith.constant 0 : index
    %c0_7 = arith.constant 0 : index
    %4 = vector.load %arg13[%c0_5, %c0_6, %c0_7] : memref<6x10x64xbf16, #tpu.memory_space<vmem>>, vector<6x1x64xbf16>
    tpu.vector_store %arg13[%c0_5, %c0_6, %c0_7], %3 {strides = array<i32>} : memref<6x10x64xbf16, #tpu.memory_space<vmem>>, vector<6x1x64xbf16>,
    %c0_8 = arith.constant 0 : index
    %c9_9 = arith.constant 9 : index
    %c0_10 = arith.constant 0 : index
    %5 = vector.load %arg13[%c0_8, %c9_9, %c0_10] : memref<6x10x64xbf16, #tpu.memory_space<vmem>>, vector<6x1x64xbf16>
    tpu.vector_store %arg13[%c0_8, %c9_9, %c0_10], %3 {strides = array<i32>} : memref<6x10x64xbf16, #tpu.memory_space<vmem>>, vector<6x1x64xbf16>,
    %c0_i32 = arith.constant 0 : i32
    %6 = arith.cmpi eq, %arg1, %c0_i32 : i32
    %7 = arith.extui %6 : i1 to i32
    %c0_i32_11 = arith.constant 0 : i32
    %8 = arith.cmpi ne, %7, %c0_i32_11 : i32
    scf.if %8 {
      %cst_136 = arith.constant 0.000000e+00 : bf16
      %166 = vector.broadcast %cst_136 : bf16 to vector<2x8x48xbf16>
      %c0_137 = arith.constant 0 : index
      %c1_138 = arith.constant 1 : index
      %c0_139 = arith.constant 0 : index
      %167 = vector.load %arg12[%c0_137, %c1_138, %c0_139] : memref<8x10x48xbf16, #tpu.memory_space<vmem>>, vector<2x8x48xbf16>
      tpu.vector_store %arg12[%c0_137, %c1_138, %c0_139], %166 {strides = array<i32>} : memref<8x10x48xbf16, #tpu.memory_space<vmem>>, vector<2x8x48xbf16>,
    } else {
    }
    %c0_i32_12 = arith.constant 0 : i32
    %9 = arith.cmpi sgt, %arg1, %c0_i32_12 : i32
    %10 = arith.extui %9 : i1 to i32
    %c0_i32_13 = arith.constant 0 : i32
    %11 = arith.cmpi ne, %10, %c0_i32_13 : i32
    scf.if %11 {
      %c0_136 = arith.constant 0 : index
      %c2_137 = arith.constant 2 : index
      %c0_138 = arith.constant 0 : index
      %c0_139 = arith.constant 0 : index
      %166 = vector.load %arg2[%c0_136, %c2_137, %c0_138, %c0_139] : memref<1x4x8x48xf32, #tpu.memory_space<vmem>>, vector<1x2x8x48xf32>
      %167 = vector.shape_cast %166 : vector<1x2x8x48xf32> to vector<2x8x48xf32>
      %168 = arith.truncf %167 : vector<2x8x48xf32> to vector<2x8x48xbf16>
      %c0_140 = arith.constant 0 : index
      %c1_141 = arith.constant 1 : index
      %c0_142 = arith.constant 0 : index
      %169 = vector.load %arg12[%c0_140, %c1_141, %c0_142] : memref<8x10x48xbf16, #tpu.memory_space<vmem>>, vector<2x8x48xbf16>
      tpu.vector_store %arg12[%c0_140, %c1_141, %c0_142], %168 {strides = array<i32>} : memref<8x10x48xbf16, #tpu.memory_space<vmem>>, vector<2x8x48xbf16>,
    } else {
    }
    %c0_14 = arith.constant 0 : index
    %c0_15 = arith.constant 0 : index
    %c0_16 = arith.constant 0 : index
    %c0_17 = arith.constant 0 : index
    %12 = vector.load %arg3[%c0_14, %c0_15, %c0_16, %c0_17] : memref<1x4x8x48xf32, #tpu.memory_space<vmem>>, vector<1x4x8x48xf32>
    %13 = vector.shape_cast %12 : vector<1x4x8x48xf32> to vector<4x8x48xf32>
    %14 = arith.truncf %13 : vector<4x8x48xf32> to vector<4x8x48xbf16>
    %c2 = arith.constant 2 : index
    %c1 = arith.constant 1 : index
    %c0_18 = arith.constant 0 : index
    %15 = vector.load %arg12[%c2, %c1, %c0_18] : memref<8x10x48xbf16, #tpu.memory_space<vmem>>, vector<4x8x48xbf16>
    tpu.vector_store %arg12[%c2, %c1, %c0_18], %14 {strides = array<i32>} : memref<8x10x48xbf16, #tpu.memory_space<vmem>>, vector<4x8x48xbf16>,
    %c1_i32 = arith.constant 1 : i32
    %16 = arith.cmpi eq, %arg1, %c1_i32 : i32
    %17 = arith.extui %16 : i1 to i32
    %c0_i32_19 = arith.constant 0 : i32
    %18 = arith.cmpi ne, %17, %c0_i32_19 : i32
    scf.if %18 {
      %cst_136 = arith.constant 0.000000e+00 : bf16
      %166 = vector.broadcast %cst_136 : bf16 to vector<2x8x48xbf16>
      %c6_137 = arith.constant 6 : index
      %c1_138 = arith.constant 1 : index
      %c0_139 = arith.constant 0 : index
      %167 = vector.load %arg12[%c6_137, %c1_138, %c0_139] : memref<8x10x48xbf16, #tpu.memory_space<vmem>>, vector<2x8x48xbf16>
      tpu.vector_store %arg12[%c6_137, %c1_138, %c0_139], %166 {strides = array<i32>} : memref<8x10x48xbf16, #tpu.memory_space<vmem>>, vector<2x8x48xbf16>,
    } else {
    }
    %c1_i32_20 = arith.constant 1 : i32
    %19 = arith.cmpi slt, %arg1, %c1_i32_20 : i32
    %20 = arith.extui %19 : i1 to i32
    %c0_i32_21 = arith.constant 0 : i32
    %21 = arith.cmpi ne, %20, %c0_i32_21 : i32
    scf.if %21 {
      %c0_136 = arith.constant 0 : index
      %c0_137 = arith.constant 0 : index
      %c0_138 = arith.constant 0 : index
      %c0_139 = arith.constant 0 : index
      %166 = vector.load %arg4[%c0_136, %c0_137, %c0_138, %c0_139] : memref<1x4x8x48xf32, #tpu.memory_space<vmem>>, vector<1x2x8x48xf32>
      %167 = vector.shape_cast %166 : vector<1x2x8x48xf32> to vector<2x8x48xf32>
      %168 = arith.truncf %167 : vector<2x8x48xf32> to vector<2x8x48xbf16>
      %c6_140 = arith.constant 6 : index
      %c1_141 = arith.constant 1 : index
      %c0_142 = arith.constant 0 : index
      %169 = vector.load %arg12[%c6_140, %c1_141, %c0_142] : memref<8x10x48xbf16, #tpu.memory_space<vmem>>, vector<2x8x48xbf16>
      tpu.vector_store %arg12[%c6_140, %c1_141, %c0_142], %168 {strides = array<i32>} : memref<8x10x48xbf16, #tpu.memory_space<vmem>>, vector<2x8x48xbf16>,
    } else {
    }
    %c0_22 = arith.constant 0 : index
    %c0_23 = arith.constant 0 : index
    %c0_24 = arith.constant 0 : index
    %22 = vector.load %arg12[%c0_22, %c0_23, %c0_24] : memref<8x10x48xbf16, #tpu.memory_space<vmem>>, vector<8x8x48xbf16>
    %23 = vector.shape_cast %22 : vector<8x8x48xbf16> to vector<64x48xbf16>
    %24 = vector.extract_strided_slice %23 {offsets = [0, 0], sizes = [48, 48], strides = [1, 1]} : vector<64x48xbf16> to vector<48x48xbf16>
    %c0_25 = arith.constant 0 : index
    %c0_26 = arith.constant 0 : index
    %c0_27 = arith.constant 0 : index
    %25 = vector.load %arg5[%c0_25, %c0_26, %c0_27] : memref<9x48x48xbf16, #tpu.memory_space<vmem>>, vector<1x48x48xbf16>
    %26 = vector.shape_cast %25 : vector<1x48x48xbf16> to vector<48x48xbf16>
    %cst_28 = arith.constant dense<0.000000e+00> : vector<48x48xf32>
    %27 = tpu.matmul %24, %26, %cst_28 {dimension_numbers = #tpu.dot_dimension_numbers<[1], [0], [0], [1], [0, 0, 1, 1], [], []>} : vector<48x48xbf16>, vector<48x48xbf16>, vector<48x48xf32> -> vector<48x48xf32>
    %28 = vector.extract_strided_slice %23 {offsets = [8, 0], sizes = [48, 48], strides = [1, 1]} : vector<64x48xbf16> to vector<48x48xbf16>
    %c3 = arith.constant 3 : index
    %c0_29 = arith.constant 0 : index
    %c0_30 = arith.constant 0 : index
    %29 = vector.load %arg5[%c3, %c0_29, %c0_30] : memref<9x48x48xbf16, #tpu.memory_space<vmem>>, vector<1x48x48xbf16>
    %30 = vector.shape_cast %29 : vector<1x48x48xbf16> to vector<48x48xbf16>
    %cst_31 = arith.constant dense<0.000000e+00> : vector<48x48xf32>
    %31 = tpu.matmul %28, %30, %cst_31 {dimension_numbers = #tpu.dot_dimension_numbers<[1], [0], [0], [1], [0, 0, 1, 1], [], []>} : vector<48x48xbf16>, vector<48x48xbf16>, vector<48x48xf32> -> vector<48x48xf32>
    %32 = arith.addf %27, %31 : vector<48x48xf32>
    %33 = vector.extract_strided_slice %23 {offsets = [16, 0], sizes = [48, 48], strides = [1, 1]} : vector<64x48xbf16> to vector<48x48xbf16>
    %c6 = arith.constant 6 : index
    %c0_32 = arith.constant 0 : index
    %c0_33 = arith.constant 0 : index
    %34 = vector.load %arg5[%c6, %c0_32, %c0_33] : memref<9x48x48xbf16, #tpu.memory_space<vmem>>, vector<1x48x48xbf16>
    %35 = vector.shape_cast %34 : vector<1x48x48xbf16> to vector<48x48xbf16>
    %cst_34 = arith.constant dense<0.000000e+00> : vector<48x48xf32>
    %36 = tpu.matmul %33, %35, %cst_34 {dimension_numbers = #tpu.dot_dimension_numbers<[1], [0], [0], [1], [0, 0, 1, 1], [], []>} : vector<48x48xbf16>, vector<48x48xbf16>, vector<48x48xf32> -> vector<48x48xf32>
    %37 = arith.addf %32, %36 : vector<48x48xf32>
    %c0_35 = arith.constant 0 : index
    %c1_36 = arith.constant 1 : index
    %c0_37 = arith.constant 0 : index
    %38 = vector.load %arg12[%c0_35, %c1_36, %c0_37] : memref<8x10x48xbf16, #tpu.memory_space<vmem>>, vector<8x8x48xbf16>
    %39 = vector.shape_cast %38 : vector<8x8x48xbf16> to vector<64x48xbf16>
    %40 = vector.extract_strided_slice %39 {offsets = [0, 0], sizes = [48, 48], strides = [1, 1]} : vector<64x48xbf16> to vector<48x48xbf16>
    %c1_38 = arith.constant 1 : index
    %c0_39 = arith.constant 0 : index
    %c0_40 = arith.constant 0 : index
    %41 = vector.load %arg5[%c1_38, %c0_39, %c0_40] : memref<9x48x48xbf16, #tpu.memory_space<vmem>>, vector<1x48x48xbf16>
    %42 = vector.shape_cast %41 : vector<1x48x48xbf16> to vector<48x48xbf16>
    %cst_41 = arith.constant dense<0.000000e+00> : vector<48x48xf32>
    %43 = tpu.matmul %40, %42, %cst_41 {dimension_numbers = #tpu.dot_dimension_numbers<[1], [0], [0], [1], [0, 0, 1, 1], [], []>} : vector<48x48xbf16>, vector<48x48xbf16>, vector<48x48xf32> -> vector<48x48xf32>
    %44 = arith.addf %37, %43 : vector<48x48xf32>
    %45 = vector.extract_strided_slice %39 {offsets = [8, 0], sizes = [48, 48], strides = [1, 1]} : vector<64x48xbf16> to vector<48x48xbf16>
    %c4 = arith.constant 4 : index
    %c0_42 = arith.constant 0 : index
    %c0_43 = arith.constant 0 : index
    %46 = vector.load %arg5[%c4, %c0_42, %c0_43] : memref<9x48x48xbf16, #tpu.memory_space<vmem>>, vector<1x48x48xbf16>
    %47 = vector.shape_cast %46 : vector<1x48x48xbf16> to vector<48x48xbf16>
    %cst_44 = arith.constant dense<0.000000e+00> : vector<48x48xf32>
    %48 = tpu.matmul %45, %47, %cst_44 {dimension_numbers = #tpu.dot_dimension_numbers<[1], [0], [0], [1], [0, 0, 1, 1], [], []>} : vector<48x48xbf16>, vector<48x48xbf16>, vector<48x48xf32> -> vector<48x48xf32>
    %49 = arith.addf %44, %48 : vector<48x48xf32>
    %50 = vector.extract_strided_slice %39 {offsets = [16, 0], sizes = [48, 48], strides = [1, 1]} : vector<64x48xbf16> to vector<48x48xbf16>
    %c7 = arith.constant 7 : index
    %c0_45 = arith.constant 0 : index
    %c0_46 = arith.constant 0 : index
    %51 = vector.load %arg5[%c7, %c0_45, %c0_46] : memref<9x48x48xbf16, #tpu.memory_space<vmem>>, vector<1x48x48xbf16>
    %52 = vector.shape_cast %51 : vector<1x48x48xbf16> to vector<48x48xbf16>
    %cst_47 = arith.constant dense<0.000000e+00> : vector<48x48xf32>
    %53 = tpu.matmul %50, %52, %cst_47 {dimension_numbers = #tpu.dot_dimension_numbers<[1], [0], [0], [1], [0, 0, 1, 1], [], []>} : vector<48x48xbf16>, vector<48x48xbf16>, vector<48x48xf32> -> vector<48x48xf32>
    %54 = arith.addf %49, %53 : vector<48x48xf32>
    %c0_48 = arith.constant 0 : index
    %c2_49 = arith.constant 2 : index
    %c0_50 = arith.constant 0 : index
    %55 = vector.load %arg12[%c0_48, %c2_49, %c0_50] : memref<8x10x48xbf16, #tpu.memory_space<vmem>>, vector<8x8x48xbf16>
    %56 = vector.shape_cast %55 : vector<8x8x48xbf16> to vector<64x48xbf16>
    %57 = vector.extract_strided_slice %56 {offsets = [0, 0], sizes = [48, 48], strides = [1, 1]} : vector<64x48xbf16> to vector<48x48xbf16>
    %c2_51 = arith.constant 2 : index
    %c0_52 = arith.constant 0 : index
    %c0_53 = arith.constant 0 : index
    %58 = vector.load %arg5[%c2_51, %c0_52, %c0_53] : memref<9x48x48xbf16, #tpu.memory_space<vmem>>, vector<1x48x48xbf16>
    %59 = vector.shape_cast %58 : vector<1x48x48xbf16> to vector<48x48xbf16>
    %cst_54 = arith.constant dense<0.000000e+00> : vector<48x48xf32>
    %60 = tpu.matmul %57, %59, %cst_54 {dimension_numbers = #tpu.dot_dimension_numbers<[1], [0], [0], [1], [0, 0, 1, 1], [], []>} : vector<48x48xbf16>, vector<48x48xbf16>, vector<48x48xf32> -> vector<48x48xf32>
    %61 = arith.addf %54, %60 : vector<48x48xf32>
    %62 = vector.extract_strided_slice %56 {offsets = [8, 0], sizes = [48, 48], strides = [1, 1]} : vector<64x48xbf16> to vector<48x48xbf16>
    %c5 = arith.constant 5 : index
    %c0_55 = arith.constant 0 : index
    %c0_56 = arith.constant 0 : index
    %63 = vector.load %arg5[%c5, %c0_55, %c0_56] : memref<9x48x48xbf16, #tpu.memory_space<vmem>>, vector<1x48x48xbf16>
    %64 = vector.shape_cast %63 : vector<1x48x48xbf16> to vector<48x48xbf16>
    %cst_57 = arith.constant dense<0.000000e+00> : vector<48x48xf32>
    %65 = tpu.matmul %62, %64, %cst_57 {dimension_numbers = #tpu.dot_dimension_numbers<[1], [0], [0], [1], [0, 0, 1, 1], [], []>} : vector<48x48xbf16>, vector<48x48xbf16>, vector<48x48xf32> -> vector<48x48xf32>
    %66 = arith.addf %61, %65 : vector<48x48xf32>
    %67 = vector.extract_strided_slice %56 {offsets = [16, 0], sizes = [48, 48], strides = [1, 1]} : vector<64x48xbf16> to vector<48x48xbf16>
    %c8 = arith.constant 8 : index
    %c0_58 = arith.constant 0 : index
    %c0_59 = arith.constant 0 : index
    %68 = vector.load %arg5[%c8, %c0_58, %c0_59] : memref<9x48x48xbf16, #tpu.memory_space<vmem>>, vector<1x48x48xbf16>
    %69 = vector.shape_cast %68 : vector<1x48x48xbf16> to vector<48x48xbf16>
    %cst_60 = arith.constant dense<0.000000e+00> : vector<48x48xf32>
    %70 = tpu.matmul %67, %69, %cst_60 {dimension_numbers = #tpu.dot_dimension_numbers<[1], [0], [0], [1], [0, 0, 1, 1], [], []>} : vector<48x48xbf16>, vector<48x48xbf16>, vector<48x48xf32> -> vector<48x48xf32>
    %71 = arith.addf %66, %70 : vector<48x48xf32>
    %c0_61 = arith.constant 0 : index
    %c0_62 = arith.constant 0 : index
    %72 = vector.load %arg6[%c0_61, %c0_62] : memref<1x48xf32, #tpu.memory_space<vmem>>, vector<1x48xf32>
    %73 = vector.broadcast %72 : vector<1x48xf32> to vector<48x48xf32>
    %74 = arith.addf %71, %73 : vector<48x48xf32>
    %cst_63 = arith.constant 0.000000e+00 : f32
    %75 = vector.broadcast %cst_63 : f32 to vector<48x48xf32>
    %76 = arith.cmpf oge, %74, %75 : vector<48x48xf32>
    %cst_64 = arith.constant 2.000000e-01 : f32
    %77 = vector.broadcast %cst_64 : f32 to vector<48x48xf32>
    %78 = arith.mulf %77, %74 : vector<48x48xf32>
    %79 = arith.select %76, %74, %78 : vector<48x48xi1>, vector<48x48xf32>
    %80 = arith.truncf %79 : vector<48x48xf32> to vector<48x48xbf16>
    %c0_65 = arith.constant 0 : index
    %c0_66 = arith.constant 0 : index
    %81 = vector.load %arg7[%c0_65, %c0_66] : memref<48x16xbf16, #tpu.memory_space<vmem>>, vector<48x16xbf16>
    %cst_67 = arith.constant dense<0.000000e+00> : vector<48x16xf32>
    %82 = tpu.matmul %80, %81, %cst_67 {dimension_numbers = #tpu.dot_dimension_numbers<[1], [0], [0], [1], [0, 0, 1, 1], [], []>} : vector<48x48xbf16>, vector<48x16xbf16>, vector<48x16xf32> -> vector<48x16xf32>
    %c0_68 = arith.constant 0 : index
    %c0_69 = arith.constant 0 : index
    %83 = vector.load %arg8[%c0_68, %c0_69] : memref<1x16xf32, #tpu.memory_space<vmem>>, vector<1x16xf32>
    %84 = vector.broadcast %83 : vector<1x16xf32> to vector<48x16xf32>
    %85 = arith.addf %82, %84 : vector<48x16xf32>
    %cst_70 = arith.constant 0.000000e+00 : f32
    %86 = vector.broadcast %cst_70 : f32 to vector<48x16xf32>
    %87 = arith.cmpf oge, %85, %86 : vector<48x16xf32>
    %cst_71 = arith.constant 2.000000e-01 : f32
    %88 = vector.broadcast %cst_71 : f32 to vector<48x16xf32>
    %89 = arith.mulf %88, %85 : vector<48x16xf32>
    %90 = arith.select %87, %85, %89 : vector<48x16xi1>, vector<48x16xf32>
    %91 = arith.truncf %90 : vector<48x16xf32> to vector<48x16xbf16>
    %92 = tpu.concatenate %80, %91 in 1 : vector<48x48xbf16>, vector<48x16xbf16> -> vector<48x64xbf16>
    %93 = vector.shape_cast %92 : vector<48x64xbf16> to vector<6x8x64xbf16>
    %c0_72 = arith.constant 0 : index
    %c1_73 = arith.constant 1 : index
    %c0_74 = arith.constant 0 : index
    %94 = vector.load %arg13[%c0_72, %c1_73, %c0_74] : memref<6x10x64xbf16, #tpu.memory_space<vmem>>, vector<6x8x64xbf16>
    tpu.vector_store %arg13[%c0_72, %c1_73, %c0_74], %93 {strides = array<i32>} : memref<6x10x64xbf16, #tpu.memory_space<vmem>>, vector<6x8x64xbf16>,
    %c0_i32_75 = arith.constant 0 : i32
    %95 = arith.cmpi eq, %arg1, %c0_i32_75 : i32
    %96 = arith.extui %95 : i1 to i32
    %c0_i32_76 = arith.constant 0 : i32
    %97 = arith.cmpi ne, %96, %c0_i32_76 : i32
    scf.if %97 {
      %cst_136 = arith.constant 0.000000e+00 : bf16
      %166 = vector.broadcast %cst_136 : bf16 to vector<1x10x64xbf16>
      %c0_137 = arith.constant 0 : index
      %c0_138 = arith.constant 0 : index
      %c0_139 = arith.constant 0 : index
      %167 = vector.load %arg13[%c0_137, %c0_138, %c0_139] : memref<6x10x64xbf16, #tpu.memory_space<vmem>>, vector<1x10x64xbf16>
      tpu.vector_store %arg13[%c0_137, %c0_138, %c0_139], %166 {strides = array<i32>} : memref<6x10x64xbf16, #tpu.memory_space<vmem>>, vector<1x10x64xbf16>,
    } else {
    }
    %c1_i32_77 = arith.constant 1 : i32
    %98 = arith.cmpi eq, %arg1, %c1_i32_77 : i32
    %99 = arith.extui %98 : i1 to i32
    %c0_i32_78 = arith.constant 0 : i32
    %100 = arith.cmpi ne, %99, %c0_i32_78 : i32
    scf.if %100 {
      %cst_136 = arith.constant 0.000000e+00 : bf16
      %166 = vector.broadcast %cst_136 : bf16 to vector<1x10x64xbf16>
      %c5_137 = arith.constant 5 : index
      %c0_138 = arith.constant 0 : index
      %c0_139 = arith.constant 0 : index
      %167 = vector.load %arg13[%c5_137, %c0_138, %c0_139] : memref<6x10x64xbf16, #tpu.memory_space<vmem>>, vector<1x10x64xbf16>
      tpu.vector_store %arg13[%c5_137, %c0_138, %c0_139], %166 {strides = array<i32>} : memref<6x10x64xbf16, #tpu.memory_space<vmem>>, vector<1x10x64xbf16>,
    } else {
    }
    %c0_79 = arith.constant 0 : index
    %c0_80 = arith.constant 0 : index
    %c0_81 = arith.constant 0 : index
    %101 = vector.load %arg13[%c0_79, %c0_80, %c0_81] : memref<6x10x64xbf16, #tpu.memory_space<vmem>>, vector<6x8x64xbf16>
    %102 = vector.shape_cast %101 : vector<6x8x64xbf16> to vector<48x64xbf16>
    %103 = vector.extract_strided_slice %102 {offsets = [0, 0], sizes = [32, 64], strides = [1, 1]} : vector<48x64xbf16> to vector<32x64xbf16>
    %c0_82 = arith.constant 0 : index
    %c0_83 = arith.constant 0 : index
    %c0_84 = arith.constant 0 : index
    %104 = vector.load %arg9[%c0_82, %c0_83, %c0_84] : memref<9x64x48xbf16, #tpu.memory_space<vmem>>, vector<1x64x48xbf16>
    %105 = vector.shape_cast %104 : vector<1x64x48xbf16> to vector<64x48xbf16>
    %cst_85 = arith.constant dense<0.000000e+00> : vector<32x48xf32>
    %106 = tpu.matmul %103, %105, %cst_85 {dimension_numbers = #tpu.dot_dimension_numbers<[1], [0], [0], [1], [0, 0, 1, 1], [], []>} : vector<32x64xbf16>, vector<64x48xbf16>, vector<32x48xf32> -> vector<32x48xf32>
    %107 = vector.extract_strided_slice %102 {offsets = [8, 0], sizes = [32, 64], strides = [1, 1]} : vector<48x64xbf16> to vector<32x64xbf16>
    %c3_86 = arith.constant 3 : index
    %c0_87 = arith.constant 0 : index
    %c0_88 = arith.constant 0 : index
    %108 = vector.load %arg9[%c3_86, %c0_87, %c0_88] : memref<9x64x48xbf16, #tpu.memory_space<vmem>>, vector<1x64x48xbf16>
    %109 = vector.shape_cast %108 : vector<1x64x48xbf16> to vector<64x48xbf16>
    %cst_89 = arith.constant dense<0.000000e+00> : vector<32x48xf32>
    %110 = tpu.matmul %107, %109, %cst_89 {dimension_numbers = #tpu.dot_dimension_numbers<[1], [0], [0], [1], [0, 0, 1, 1], [], []>} : vector<32x64xbf16>, vector<64x48xbf16>, vector<32x48xf32> -> vector<32x48xf32>
    %111 = arith.addf %106, %110 : vector<32x48xf32>
    %112 = vector.extract_strided_slice %102 {offsets = [16, 0], sizes = [32, 64], strides = [1, 1]} : vector<48x64xbf16> to vector<32x64xbf16>
    %c6_90 = arith.constant 6 : index
    %c0_91 = arith.constant 0 : index
    %c0_92 = arith.constant 0 : index
    %113 = vector.load %arg9[%c6_90, %c0_91, %c0_92] : memref<9x64x48xbf16, #tpu.memory_space<vmem>>, vector<1x64x48xbf16>
    %114 = vector.shape_cast %113 : vector<1x64x48xbf16> to vector<64x48xbf16>
    %cst_93 = arith.constant dense<0.000000e+00> : vector<32x48xf32>
    %115 = tpu.matmul %112, %114, %cst_93 {dimension_numbers = #tpu.dot_dimension_numbers<[1], [0], [0], [1], [0, 0, 1, 1], [], []>} : vector<32x64xbf16>, vector<64x48xbf16>, vector<32x48xf32> -> vector<32x48xf32>
    %116 = arith.addf %111, %115 : vector<32x48xf32>
    %c0_94 = arith.constant 0 : index
    %c1_95 = arith.constant 1 : index
    %c0_96 = arith.constant 0 : index
    %117 = vector.load %arg13[%c0_94, %c1_95, %c0_96] : memref<6x10x64xbf16, #tpu.memory_space<vmem>>, vector<6x8x64xbf16>
    %118 = vector.shape_cast %117 : vector<6x8x64xbf16> to vector<48x64xbf16>
    %119 = vector.extract_strided_slice %118 {offsets = [0, 0], sizes = [32, 64], strides = [1, 1]} : vector<48x64xbf16> to vector<32x64xbf16>
    %c1_97 = arith.constant 1 : index
    %c0_98 = arith.constant 0 : index
    %c0_99 = arith.constant 0 : index
    %120 = vector.load %arg9[%c1_97, %c0_98, %c0_99] : memref<9x64x48xbf16, #tpu.memory_space<vmem>>, vector<1x64x48xbf16>
    %121 = vector.shape_cast %120 : vector<1x64x48xbf16> to vector<64x48xbf16>
    %cst_100 = arith.constant dense<0.000000e+00> : vector<32x48xf32>
    %122 = tpu.matmul %119, %121, %cst_100 {dimension_numbers = #tpu.dot_dimension_numbers<[1], [0], [0], [1], [0, 0, 1, 1], [], []>} : vector<32x64xbf16>, vector<64x48xbf16>, vector<32x48xf32> -> vector<32x48xf32>
    %123 = arith.addf %116, %122 : vector<32x48xf32>
    %124 = vector.extract_strided_slice %118 {offsets = [8, 0], sizes = [32, 64], strides = [1, 1]} : vector<48x64xbf16> to vector<32x64xbf16>
    %c4_101 = arith.constant 4 : index
    %c0_102 = arith.constant 0 : index
    %c0_103 = arith.constant 0 : index
    %125 = vector.load %arg9[%c4_101, %c0_102, %c0_103] : memref<9x64x48xbf16, #tpu.memory_space<vmem>>, vector<1x64x48xbf16>
    %126 = vector.shape_cast %125 : vector<1x64x48xbf16> to vector<64x48xbf16>
    %cst_104 = arith.constant dense<0.000000e+00> : vector<32x48xf32>
    %127 = tpu.matmul %124, %126, %cst_104 {dimension_numbers = #tpu.dot_dimension_numbers<[1], [0], [0], [1], [0, 0, 1, 1], [], []>} : vector<32x64xbf16>, vector<64x48xbf16>, vector<32x48xf32> -> vector<32x48xf32>
    %128 = arith.addf %123, %127 : vector<32x48xf32>
    %129 = vector.extract_strided_slice %118 {offsets = [16, 0], sizes = [32, 64], strides = [1, 1]} : vector<48x64xbf16> to vector<32x64xbf16>
    %c7_105 = arith.constant 7 : index
    %c0_106 = arith.constant 0 : index
    %c0_107 = arith.constant 0 : index
    %130 = vector.load %arg9[%c7_105, %c0_106, %c0_107] : memref<9x64x48xbf16, #tpu.memory_space<vmem>>, vector<1x64x48xbf16>
    %131 = vector.shape_cast %130 : vector<1x64x48xbf16> to vector<64x48xbf16>
    %cst_108 = arith.constant dense<0.000000e+00> : vector<32x48xf32>
    %132 = tpu.matmul %129, %131, %cst_108 {dimension_numbers = #tpu.dot_dimension_numbers<[1], [0], [0], [1], [0, 0, 1, 1], [], []>} : vector<32x64xbf16>, vector<64x48xbf16>, vector<32x48xf32> -> vector<32x48xf32>
    %133 = arith.addf %128, %132 : vector<32x48xf32>
    %c0_109 = arith.constant 0 : index
    %c2_110 = arith.constant 2 : index
    %c0_111 = arith.constant 0 : index
    %134 = vector.load %arg13[%c0_109, %c2_110, %c0_111] : memref<6x10x64xbf16, #tpu.memory_space<vmem>>, vector<6x8x64xbf16>
    %135 = vector.shape_cast %134 : vector<6x8x64xbf16> to vector<48x64xbf16>
    %136 = vector.extract_strided_slice %135 {offsets = [0, 0], sizes = [32, 64], strides = [1, 1]} : vector<48x64xbf16> to vector<32x64xbf16>
    %c2_112 = arith.constant 2 : index
    %c0_113 = arith.constant 0 : index
    %c0_114 = arith.constant 0 : index
    %137 = vector.load %arg9[%c2_112, %c0_113, %c0_114] : memref<9x64x48xbf16, #tpu.memory_space<vmem>>, vector<1x64x48xbf16>
    %138 = vector.shape_cast %137 : vector<1x64x48xbf16> to vector<64x48xbf16>
    %cst_115 = arith.constant dense<0.000000e+00> : vector<32x48xf32>
    %139 = tpu.matmul %136, %138, %cst_115 {dimension_numbers = #tpu.dot_dimension_numbers<[1], [0], [0], [1], [0, 0, 1, 1], [], []>} : vector<32x64xbf16>, vector<64x48xbf16>, vector<32x48xf32> -> vector<32x48xf32>
    %140 = arith.addf %133, %139 : vector<32x48xf32>
    %141 = vector.extract_strided_slice %135 {offsets = [8, 0], sizes = [32, 64], strides = [1, 1]} : vector<48x64xbf16> to vector<32x64xbf16>
    %c5_116 = arith.constant 5 : index
    %c0_117 = arith.constant 0 : index
    %c0_118 = arith.constant 0 : index
    %142 = vector.load %arg9[%c5_116, %c0_117, %c0_118] : memref<9x64x48xbf16, #tpu.memory_space<vmem>>, vector<1x64x48xbf16>
    %143 = vector.shape_cast %142 : vector<1x64x48xbf16> to vector<64x48xbf16>
    %cst_119 = arith.constant dense<0.000000e+00> : vector<32x48xf32>
    %144 = tpu.matmul %141, %143, %cst_119 {dimension_numbers = #tpu.dot_dimension_numbers<[1], [0], [0], [1], [0, 0, 1, 1], [], []>} : vector<32x64xbf16>, vector<64x48xbf16>, vector<32x48xf32> -> vector<32x48xf32>
    %145 = arith.addf %140, %144 : vector<32x48xf32>
    %146 = vector.extract_strided_slice %135 {offsets = [16, 0], sizes = [32, 64], strides = [1, 1]} : vector<48x64xbf16> to vector<32x64xbf16>
    %c8_120 = arith.constant 8 : index
    %c0_121 = arith.constant 0 : index
    %c0_122 = arith.constant 0 : index
    %147 = vector.load %arg9[%c8_120, %c0_121, %c0_122] : memref<9x64x48xbf16, #tpu.memory_space<vmem>>, vector<1x64x48xbf16>
    %148 = vector.shape_cast %147 : vector<1x64x48xbf16> to vector<64x48xbf16>
    %cst_123 = arith.constant dense<0.000000e+00> : vector<32x48xf32>
    %149 = tpu.matmul %146, %148, %cst_123 {dimension_numbers = #tpu.dot_dimension_numbers<[1], [0], [0], [1], [0, 0, 1, 1], [], []>} : vector<32x64xbf16>, vector<64x48xbf16>, vector<32x48xf32> -> vector<32x48xf32>
    %150 = arith.addf %145, %149 : vector<32x48xf32>
    %c0_124 = arith.constant 0 : index
    %c0_125 = arith.constant 0 : index
    %151 = vector.load %arg10[%c0_124, %c0_125] : memref<1x48xf32, #tpu.memory_space<vmem>>, vector<1x48xf32>
    %152 = vector.broadcast %151 : vector<1x48xf32> to vector<32x48xf32>
    %153 = arith.addf %150, %152 : vector<32x48xf32>
    %cst_126 = arith.constant 0.000000e+00 : f32
    %154 = vector.broadcast %cst_126 : f32 to vector<32x48xf32>
    %155 = arith.cmpf oge, %153, %154 : vector<32x48xf32>
    %cst_127 = arith.constant 2.000000e-01 : f32
    %156 = vector.broadcast %cst_127 : f32 to vector<32x48xf32>
    %157 = arith.mulf %156, %153 : vector<32x48xf32>
    %158 = arith.select %155, %153, %157 : vector<32x48xi1>, vector<32x48xf32>
    %c0_128 = arith.constant 0 : index
    %c0_129 = arith.constant 0 : index
    %c0_130 = arith.constant 0 : index
    %c0_131 = arith.constant 0 : index
    %159 = vector.load %arg3[%c0_128, %c0_129, %c0_130, %c0_131] : memref<1x4x8x48xf32, #tpu.memory_space<vmem>>, vector<1x4x8x48xf32>
    %160 = vector.shape_cast %159 : vector<1x4x8x48xf32> to vector<4x8x48xf32>
    %161 = vector.shape_cast %158 : vector<32x48xf32> to vector<4x8x48xf32>
    %162 = arith.addf %160, %161 : vector<4x8x48xf32>
    %c0_132 = arith.constant 0 : index
    %c0_133 = arith.constant 0 : index
    %c0_134 = arith.constant 0 : index
    %c0_135 = arith.constant 0 : index
    %163 = vector.load %arg11[%c0_132, %c0_133, %c0_134, %c0_135] : memref<1x4x8x48xf32, #tpu.memory_space<vmem>>, vector<1x4x8x48xf32>
    %164 = vector.shape_cast %163 : vector<1x4x8x48xf32> to vector<4x8x48xf32>
    %165 = vector.shape_cast %162 : vector<4x8x48xf32> to vector<1x4x8x48xf32>
    tpu.vector_store %arg11[%c0_132, %c0_133, %c0_134, %c0_135], %165 {strides = array<i32>} : memref<1x4x8x48xf32, #tpu.memory_space<vmem>>, vector<1x4x8x48xf32>,
    return
  }
  func.func @transform_0(%arg0: i32, %arg1: i32) -> (i32, i32, i32, i32) {
    %c1_i32 = arith.constant 1 : i32
    %0 = arith.subi %arg1, %c1_i32 : i32
    %c0_i32 = arith.constant 0 : i32
    %1 = arith.maxsi %0, %c0_i32 : i32
    %c0_i32_0 = arith.constant 0 : i32
    %c0_i32_1 = arith.constant 0 : i32
    %c0_i32_2 = arith.constant 0 : i32
    return %arg0, %1, %c0_i32_0, %c0_i32_1 : i32, i32, i32, i32
  }
  func.func @transform_1(%arg0: i32, %arg1: i32) -> (i32, i32, i32, i32) {
    %c0_i32 = arith.constant 0 : i32
    %c0_i32_0 = arith.constant 0 : i32
    %c0_i32_1 = arith.constant 0 : i32
    return %arg0, %arg1, %c0_i32, %c0_i32_0 : i32, i32, i32, i32
  }
  func.func @transform_2(%arg0: i32, %arg1: i32) -> (i32, i32, i32, i32) {
    %c1_i32 = arith.constant 1 : i32
    %0 = arith.addi %arg1, %c1_i32 : i32
    %c1_i32_0 = arith.constant 1 : i32
    %1 = arith.minsi %0, %c1_i32_0 : i32
    %c0_i32 = arith.constant 0 : i32
    %c0_i32_1 = arith.constant 0 : i32
    %c0_i32_2 = arith.constant 0 : i32
    return %arg0, %1, %c0_i32, %c0_i32_1 : i32, i32, i32, i32
  }
  func.func @transform_3(%arg0: i32, %arg1: i32) -> (i32, i32, i32) {
    %c0_i32 = arith.constant 0 : i32
    %c0_i32_0 = arith.constant 0 : i32
    %c0_i32_1 = arith.constant 0 : i32
    %c0_i32_2 = arith.constant 0 : i32
    return %c0_i32, %c0_i32_0, %c0_i32_1 : i32, i32, i32
  }
  func.func @transform_4(%arg0: i32, %arg1: i32) -> (i32, i32) {
    %c0_i32 = arith.constant 0 : i32
    %c0_i32_0 = arith.constant 0 : i32
    %c0_i32_1 = arith.constant 0 : i32
    return %c0_i32, %c0_i32_0 : i32, i32
  }
  func.func @transform_5(%arg0: i32, %arg1: i32) -> (i32, i32) {
    %c0_i32 = arith.constant 0 : i32
    %c0_i32_0 = arith.constant 0 : i32
    %c0_i32_1 = arith.constant 0 : i32
    return %c0_i32, %c0_i32_0 : i32, i32
  }
  func.func @transform_6(%arg0: i32, %arg1: i32) -> (i32, i32) {
    %c0_i32 = arith.constant 0 : i32
    %c0_i32_0 = arith.constant 0 : i32
    %c0_i32_1 = arith.constant 0 : i32
    return %c0_i32, %c0_i32_0 : i32, i32
  }
  func.func @transform_7(%arg0: i32, %arg1: i32) -> (i32, i32, i32) {
    %c0_i32 = arith.constant 0 : i32
    %c0_i32_0 = arith.constant 0 : i32
    %c0_i32_1 = arith.constant 0 : i32
    %c0_i32_2 = arith.constant 0 : i32
    return %c0_i32, %c0_i32_0, %c0_i32_1 : i32, i32, i32
  }
  func.func @transform_8(%arg0: i32, %arg1: i32) -> (i32, i32) {
    %c0_i32 = arith.constant 0 : i32
    %c0_i32_0 = arith.constant 0 : i32
    %c0_i32_1 = arith.constant 0 : i32
    return %c0_i32, %c0_i32_0 : i32, i32
  }
  func.func @transform_9(%arg0: i32, %arg1: i32) -> (i32, i32, i32, i32) {
    %c0_i32 = arith.constant 0 : i32
    %c0_i32_0 = arith.constant 0 : i32
    %c0_i32_1 = arith.constant 0 : i32
    return %arg0, %arg1, %c0_i32, %c0_i32_0 : i32, i32, i32, i32
  }
}

</mosaic_0001>

<bundles_post_ra>
// kernel: pfrb_forward.1
= control target key start
LH: loop header
LB: loop body
LE: loop exit
PB: predicated region body
PF: predicated region fallthrough
CT: control target
= control target key end

     0   :  { %14 = vsyncpa [#allocation5], 0  ;;  %s5381_s0 = inlined_call_operand.vmem [shape: f32[2,8,8,48], index: 0, kind: input, shape index: {}, may-alias: {0,1,2}]   ;;  %s5382_s1 = inlined_call_operand.vmem [shape: f32[2,8,8,48], index: 1, kind: input, shape index: {}, may-alias: {0,1,2}]   ;;  %s5383_s2 = inlined_call_operand.vmem [shape: f32[2,8,8,48], index: 2, kind: input, shape index: {}, may-alias: {0,1,2}]   ;;  %s5384_s3 = inlined_call_operand.vmem [shape: bf16[9,48,48], index: 3, kind: input, shape index: {}]   ;;  %s5385_s4 = inlined_call_operand.vmem [shape: f32[1,48], index: 4, kind: input, shape index: {}]   ;;  %s5386_s5 = inlined_call_operand.vmem [shape: bf16[48,16], index: 5, kind: input, shape index: {}]   ;;  %s5387_s6 = inlined_call_operand.vmem [shape: f32[1,16], index: 6, kind: input, shape index: {}]   ;;  %s5388_s7 = inlined_call_operand.vmem [shape: bf16[9,64,48], index: 7, kind: input, shape index: {}]   ;;  %s5389_s8 = inlined_call_operand.vmem [shape: f32[1,48], index: 8, kind: input, shape index: {}]   ;;  %s5390_s9 = inlined_call_operand.hbm [shape: f32[2,8,8,48], index: 9, kind: output, shape index: {}]  }
   0x1   :  { %16 = vsyncpa [#allocation5 + $0x1], 0  ;;  %s4416_s30 = smov 0   ;;  %s4418_s10 = smov 0  }
   0x2   :  { %s4420_s11 = smov 0   ;;  %s4422_s12 = smov 0  }
   0x3   :  { %s4424_s13 = smov 0   ;;  %s4426_s14 = smov 0  }
   0x4   :  { %s4428_s15 = smov 0   ;;  %s4430_s16 = smov 0  }
   0x5 LB: > { %5397 = sst [smem:[#allocation7_spill]] %s4348_s14  ;;  %s3339_s17 = sadd.s32 4294967295, %s4356_s16   ;;  %s4356_s16 = sphi %s4430_s16, %s22_s16   ;;  %s4352_s15 = sphi %s4428_s15, %s5429_s15   ;;  %s4348_s14 = sphi %s4426_s14, %s5428_s14   ;;  %s4344_s13 = sphi %s4424_s13, %s5427_s13   ;;  %s4340_s12 = sphi %s4422_s12, %s5433_s12   ;;  %s4336_s11 = sphi %s4420_s11, %s5432_s11   ;;  %s4332_s10 = sphi %s4418_s10, %s5431_s10   ;;  %s4328_s30 = sphi %s4416_s30, %s5430_s30  }
   0x6   : > { %5398 = sst [smem:[#allocation8_spill]] %s4352_s15  ;;  %s3340_s18 = sadd.s32 4294967294, %s4356_s16  }
   0x7   : > { %s31_s19 = sadd.s32 1, %s4348_s14  ;;  %s34_s20 = sadd.s32 1, %s4352_s15 }
   0x8   : > { %p32_p0 = scmp.ge.s32.totalorder %s31_s19, 2  ;;  %p275_p1 = scmp.ne.s32.totalorder %s4336_s11, %s4332_s10 }
   0x9   : > { %p276_p2 = scmp.eq.s32.totalorder %s3339_s17, 3  ;;  %p281_p5 = scmp.ne.s32.totalorder %s4332_s10, %s4328_s30 }
   0xa   : > { %s5435_s19 = smov (%p32_p0, %s31_s19), 0  ;;  %s5437_s20 = smov (!%p32_p0, %s34_s20), %s4352_s15 }
   0xb   : > { %5399 = sst [smem:[#allocation9_spill]] %s5435_s19  ;;  %s261_s21 = ssub.s32 %s4348_s14, %s5435_s19 }
   0xc   : > { %p4467_p3 = por %p276_p2, %p275_p1  ;;  %p36_p4 = scmp.ge.s32.totalorder %s5437_s20, 2 }
   0xd   : > { %p282_p6 = scmp.eq.s32.totalorder %s3340_s18, 3  ;;  %p3345_p7 = scmp.ge.s32.totalorder %s4356_s16, 1 }
   0xe   : > { %s5439_s20 = smov (%p36_p4, %s5437_s20), 0  ;;  %p369_p9 = scmp.lt.s32.totalorder %s4356_s16, 5 }
   0xf   : > { %5401 = sst [smem:[#allocation10_spill]] %s5439_s20  ;;  %p4476_p8 = por %p282_p6, %p281_p5 }
  0x10   : > { %s260_s24 = ssub.s32 %s4352_s15, %s5439_s20  ;;  %s265_s25 = sadd.s32 1, %s4336_s11 }
  0x11   : > { %s262_s26 = sor.u32 %s261_s21, %s260_s24  ;;  %p370_p10 = pnand %p3345_p7, %p369_p9 }
  0x12   : > { %p263_p11 = scmp.eq.s32.totalorder %s262_s26, 0  ;;  %s5391_s28 = sand.u32 (!%p370_p10), 1, %s4332_s10   ;;  %vm477_vm0 = vcmask (!%p370_p10), 385024   ;;  %vm478_vm1 = vsmask.f32 (!%p370_p10), 256  ;;  %vm530_vm5 = vcmask (!%p370_p10), 516096  }
  0x13   : > { %373 = sbr.rel (%p370_p10) target bundleno = 1236 (0x4d4), region = 56  ;;  %s3347_s29 = sadd.s32 (!%p370_p10), 4294967295, %s4340_s12  ;;  %vm4495_vm2 = vmand (!%p370_p10), %vm477_vm0, %vm478_vm1  ;;  %v480_v1 = vld [vmem:[#allocation2] sm:$0x1] (!%p370_p10)  ;;  %v483_v2 = vld [vmem:[#allocation2 + $0x8] sm:$0x1] (!%p370_p10) }
  0x14   : > { %s4485_s27 = scalar_select %p263_p11, %s4336_s11, %s265_s25  }
  0x15   : > { %s4491_s17 = sshll.u32 (!%p370_p10), %s5391_s28, 5  ;;  %p434_p12 = scmp.gt.s32.totalorder (!%p370_p10), %s3347_s29, 0  ;;  %v481_v3 = vsel (!%p370_p10), %vm4495_vm2, 0, %v480_v1  ;;  %v484_v4 = vsel (!%p370_p10), %vm4495_vm2, 0, %v483_v2  ;;  %v486_v5 = vld [vmem:[#allocation2 + $0x10] sm:$0x1] (!%p370_p10)  ;;  %vm4551_vm6 = vmand (!%p370_p10), %vm530_vm5, %vm478_vm1 }
  0x16   : > { %5403 = sst [smem:[#allocation11_spill]] %s4485_s27  ;;  %p437_p13 = scmp.lt.s32.totalorder (!%p370_p10), %s4344_s13, 1  ;;  %482 = vst [vmem:[#allocation2] sm:$0x1] (!%p370_p10), %v481_v3  ;;  %485 = vst [vmem:[#allocation2 + $0x8] sm:$0x1] (!%p370_p10), %v484_v4 }
  0x17   : > { %v487_v6 = vsel (!%p370_p10), %vm4495_vm2, 0, %v486_v5  ;;  %v489_v7 = vld [vmem:[#allocation2 + $0x18] sm:$0x1] (!%p370_p10)  ;;  %v492_v8 = vld [vmem:[#allocation2 + $0x20] sm:$0x1] (!%p370_p10)  ;;  %s4512_s24 = sshll.u32 (!%p370_p10), %s4340_s12, 2 }
  0x18   : > { %488 = vst [vmem:[#allocation2 + $0x10] sm:$0x1] (!%p370_p10), %v487_v6  ;;  %v490_v9 = vsel (!%p370_p10), %vm4495_vm2, 0, %v489_v7  ;;  %v493_v10 = vsel (!%p370_p10), %vm4495_vm2, 0, %v492_v8  ;;  %v495_v11 = vld [vmem:[#allocation2 + $0x28] sm:$0x1] (!%p370_p10) }
  0x19   : > { %491 = vst [vmem:[#allocation2 + $0x18] sm:$0x1] (!%p370_p10), %v490_v9  ;;  %494 = vst [vmem:[#allocation2 + $0x20] sm:$0x1] (!%p370_p10), %v493_v10  ;;  %v496_v12 = vsel (!%p370_p10), %vm4495_vm2, 0, %v495_v11  ;;  %p452_p1 = scmp.lt.s32.totalorder (!%p370_p10), %s4512_s24, 7 }
  0x1a   : > { %s5441_s29 = smov (!%p434_p12, %s3347_s29), 0  ;;  %v498_v13 = vld [vmem:[#allocation2 + $0x30] sm:$0x1]  ;;  %497 = vst [vmem:[#allocation2 + $0x28] sm:$0x1] %v496_v12  ;;  %s5394_s26 = sadd.s32 1, %s4340_s12 }
  0x1b   : > { %s438_s18 = scalar_select %p437_p13, %s4344_s13, 1  ;;  %v499_v14 = vsel %vm4495_vm2, 0, %v498_v13  ;;  %v501_v15 = vld [vmem:[#allocation2 + $0x38] sm:$0x1]  ;;  %vm504_vm3 = vsmask.f32 7938 }
  0x1c   : > { %s3348_s21 = sshll.u32 %s5441_s29, 2  ;;  %500 = vst [vmem:[#allocation2 + $0x30] sm:$0x1] %v499_v14  ;;  %v502_v16 = vsel %vm4495_vm2, 0, %v501_v15  ;;  %vm4526_vm4 = vmand %vm477_vm0, %vm504_vm3  ;;  %v506_v18 = vld [vmem:[#allocation2 + $0x4] sm:$0x1] }
  0x1d   : > { %p439_p0 = scmp.lt.s32.totalorder %s3348_s21, 7  ;;  %s4516_s25 = sshll.u32 %s438_s18, 3  ;;  %503 = vst [vmem:[#allocation2 + $0x38] sm:$0x1] %v502_v16  ;;  %v509_v19 = vld [vmem:[#allocation2 + $0xc] sm:$0x1]  ;;  %vm4583_vm7 = vmand %vm530_vm5, %vm504_vm3 }
  0x1e   : > { %s453_s29 = scalar_select %p452_p1, %s4512_s24, 7  ;;  %v507_v20 = vsel %vm4526_vm4, 0, %v506_v18  ;;  %v510_v21 = vsel %vm4526_vm4, 0, %v509_v19  ;;  %v512_v22 = vld [vmem:[#allocation2 + $0x14] sm:$0x1] }
  0x1f   : > { %s5443_s21 = smov (!%p439_p0, %s3348_s21), 7  ;;  %p4538_p2 = scmp.lt.s32.totalorder %s5394_s26, 1  ;;  %508 = vst [vmem:[#allocation2 + $0x4] sm:$0x1] %v507_v20  ;;  %511 = vst [vmem:[#allocation2 + $0xc] sm:$0x1] %v510_v21 }
  0x20   : > { %s442_s18 = sadd.s32 %s4516_s25, %s5443_s21  ;;  %v513_v23 = vsel %vm4526_vm4, 0, %v512_v22  ;;  %v515_v24 = vld [vmem:[#allocation2 + $0x1c] sm:$0x1]  ;;  %v518_v25 = vld [vmem:[#allocation2 + $0x24] sm:$0x1]  ;;  %s455_s19 = sadd.s32 %s4516_s25, %s453_s29 }
  0x21   : > { %s3350_s20 = sshll.u32 %s442_s18, 3  ;;  %514 = vst [vmem:[#allocation2 + $0x14] sm:$0x1] %v513_v23  ;;  %v516_v26 = vsel %vm4526_vm4, 0, %v515_v24  ;;  %v519_v27 = vsel %vm4526_vm4, 0, %v518_v25  ;;  %s3353_s18 = sshll.u32 %s455_s19, 3 }
  0x22   : > { %v521_v28 = vld [vmem:[#allocation2 + $0x2c] sm:$0x1]  ;;  %s4558_s29 = scalar_lea.vmem %s5381_s0, %s3350_s20  ;;  %517 = vst [vmem:[#allocation2 + $0x1c] sm:$0x1] %v516_v26  ;;  %520 = vst [vmem:[#allocation2 + $0x24] sm:$0x1] %v519_v27  ;;  %s4565_s27 = scalar_lea.vmem %s5382_s1, %s3353_s18 }
  0x23   : > { %v522_v30 = vsel %vm4526_vm4, 0, %v521_v28  ;;  %v524_v31 = vld [vmem:[#allocation2 + $0x34] sm:$0x1]  ;;  %v527_v32 = vld [vmem:[#allocation2 + $0x3c] sm:$0x1]  ;;  %s5411_s19 = sadd.s32 1, %s4340_s12 }
  0x24   : > { %523 = vst [vmem:[#allocation2 + $0x2c] sm:$0x1] %v522_v30  ;;  %v525_v33 = vsel %vm4526_vm4, 0, %v524_v31  ;;  %v528_v34 = vsel %vm4526_vm4, 0, %v527_v32  ;;  %v532_v35 = vld [vmem:[#allocation3] sm:$0x1] }
  0x25   : > { %v535_v36 = vld [vmem:[#allocation3 + $0x8] sm:$0x1]  ;;  %s5445_s19 = smov (!%p4538_p2, %s5411_s19), 1  ;;  %526 = vst [vmem:[#allocation2 + $0x34] sm:$0x1] %v525_v33  ;;  %v533_v37 = vsel %vm4551_vm6, 0, %v532_v35 }
  0x26   : > { %529 = vst [vmem:[#allocation2 + $0x3c] sm:$0x1] %v528_v34  ;;  %v536_v38 = vsel %vm4551_vm6, 0, %v535_v36  ;;  %v538_v39 = vld [vmem:[#allocation3 + $0x10] sm:$0x1]  ;;  %s3354_s14 = sshll.u32 %s5445_s19, 2 }
  0x27   : > { %534 = vst [vmem:[#allocation3] sm:$0x1] %v533_v37  ;;  %537 = vst [vmem:[#allocation3 + $0x8] sm:$0x1] %v536_v38  ;;  %v539_v40 = vsel %vm4551_vm6, 0, %v538_v39  ;;  %p465_p4 = scmp.lt.s32.totalorder %s3354_s14, 7 }
  0x28   : > { %v541_v41 = vld [vmem:[#allocation3 + $0x18] sm:$0x1]  ;;  %v544_v42 = vld [vmem:[#allocation3 + $0x20] sm:$0x1]  ;;  %540 = vst [vmem:[#allocation3 + $0x10] sm:$0x1] %v539_v40 }
  0x29   : > { %v542_v44 = vsel %vm4551_vm6, 0, %v541_v41  ;;  %v545_v45 = vsel %vm4551_vm6, 0, %v544_v42  ;;  %v547_v46 = vld [vmem:[#allocation3 + $0x28] sm:$0x1]  ;;  %v551_v48 = vld [vmem:[#allocation3 + $0x4] sm:$0x1] }
  0x2a   : > { %543 = vst [vmem:[#allocation3 + $0x18] sm:$0x1] %v542_v44  ;;  %546 = vst [vmem:[#allocation3 + $0x20] sm:$0x1] %v545_v45  ;;  %v548_v47 = vsel %vm4551_vm6, 0, %v547_v46  ;;  %v552_v50 = vsel %vm4583_vm7, 0, %v551_v48 }
  0x2b   : > { %v554_v49 = vld [vmem:[#allocation3 + $0xc] sm:$0x1]  ;;  %549 = vst [vmem:[#allocation3 + $0x28] sm:$0x1] %v548_v47  ;;  %v557_v52 = vld [vmem:[#allocation3 + $0x14] sm:$0x1] }
  0x2c   : > { %v555_v51 = vsel %vm4583_vm7, 0, %v554_v49  ;;  %v560_v53 = vld [vmem:[#allocation3 + $0x1c] sm:$0x1]  ;;  %s5447_s14 = smov (!%p465_p4, %s3354_s14), 7  ;;  %553 = vst [vmem:[#allocation3 + $0x4] sm:$0x1] %v552_v50 }
  0x2d   : > { %556 = vst [vmem:[#allocation3 + $0xc] sm:$0x1] %v555_v51  ;;  %v558_v54 = vsel %vm4583_vm7, 0, %v557_v52  ;;  %v561_v55 = vsel %vm4583_vm7, 0, %v560_v53  ;;  %v563_v56 = vld [vmem:[#allocation3 + $0x24] sm:$0x1]  ;;  %s468_s15 = sadd.s32 %s4516_s25, %s5447_s14 }
  0x2e   : > { %559 = vst [vmem:[#allocation3 + $0x14] sm:$0x1] %v558_v54  ;;  %562 = vst [vmem:[#allocation3 + $0x1c] sm:$0x1] %v561_v55  ;;  %v564_v57 = vsel %vm4583_vm7, 0, %v563_v56  ;;  %s3356_s20 = sshll.u32 %s468_s15, 3 }
  0x2f   : > { %v566_v58 = vld [vmem:[#allocation3 + $0x2c] sm:$0x1]  ;;  %565 = vst [vmem:[#allocation3 + $0x24] sm:$0x1] %v564_v57  ;;  %s4609_s21 = scalar_lea.vmem %s5383_s2, %s3356_s20  ;;  %s4612_s18 = scalar_lea.vmem [#allocation4], %s4491_s17 }
  0x30   : > { %v567_v59 = vsel %vm4583_vm7, 0, %v566_v58  ;;  %p3357_p5 = scmp.ne.s32.totalorder %s4340_s12, 0 }
  0x31   : > { %568 = vst [vmem:[#allocation3 + $0x2c] sm:$0x1] %v567_v59  ;;  %vm573_vm8 = vcmask (!%p3357_p5), 388096   ;;  %v575_v60 = vld [vmem:[#allocation2] sm:$0xf] (!%p3357_p5) }
  0x32   : > { %572 = sbr.rel (%p3357_p5) target bundleno = 57 (0x39), region = 60  ;;  %v578_v61 = vld [vmem:[#allocation2 + $0x4] sm:$0x1] (!%p3357_p5)  ;;  %vm574_vm9 = vmand (!%p3357_p5), %vm573_vm8, %vm504_vm3  ;;  %v581_v63 = vld [vmem:[#allocation2 + $0x8] sm:$0xf] (!%p3357_p5) }
  0x33   : > { %v579_v62 = vsel (!%p3357_p5), %vm4495_vm2, 0, %v578_v61  ;;  %v584_v1 = vld [vmem:[#allocation2 + $0xc] sm:$0x1] (!%p3357_p5)  ;;  %v576_v2 = vsel (!%p3357_p5), %vm574_vm9, 0, %v575_v60  ;;  %v582_v3 = vsel (!%p3357_p5), %vm574_vm9, 0, %v581_v63 }
  0x34   : > { %580 = vst [vmem:[#allocation2 + $0x4] sm:$0x1] (!%p3357_p5), %v579_v62  ;;  %v585_v4 = vsel (!%p3357_p5), %vm4495_vm2, 0, %v584_v1  ;;  %577 = vst [vmem:[#allocation2] sm:$0xf] (!%p3357_p5), %v576_v2 }
  0x35   : > { %583 = vst [vmem:[#allocation2 + $0x8] sm:$0xf] (!%p3357_p5), %v582_v3  ;;  %586 = vst [vmem:[#allocation2 + $0xc] sm:$0x1] (!%p3357_p5), %v585_v4 }
  0x39 PF: > { %p3358_p6 = scmp.le.s32.totalorder %s4340_s12, 0 }
  0x3a   : > { %v3359_v5 = vld [vmem:[%s4558_s29 + $0x10] sm:$0xff] (!%p3358_p6)  ;;  %v3360_v7 = vld [vmem:[%s4558_s29 + $0x18] sm:$0xff] (!%p3358_p6)  ;;  %vm622_vm10 = vcmask (!%p3358_p6), 388096  }
  0x3b   : > { %590 = sbr.rel (%p3358_p6) target bundleno = 70 (0x46), region = 64  ;;  %v3664_v6 = vpack.c.bf16 (!%p3358_p6), %v3359_v5, %v3359_v5  ;;  %v3665_v8 = vpack.c.bf16 (!%p3358_p6), %v3360_v7, %v3360_v7  ;;  %vm4626_vm11 = vmand (!%p3358_p6), %vm622_vm10, %vm504_vm3  ;;  %v624_v15 = vld [vmem:[#allocation2] sm:$0xf] (!%p3358_p6)  ;;  %v627_v16 = vld [vmem:[#allocation2 + $0x4] sm:$0x1] (!%p3358_p6) }
  0x3c   : > { %v630_v20 = vld [vmem:[#allocation2 + $0x8] sm:$0xf] (!%p3358_p6)  ;;  %v633_v21 = vld [vmem:[#allocation2 + $0xc] sm:$0x1] (!%p3358_p6) }
  0x3d   : > { %v603_v9 = vshrl.u32 (!%p3358_p6), %v3664_v6, 16  ;;  %v606_v10 = vshll.u32 (!%p3358_p6), %v3664_v6, 16  ;;  %v611_v11 = vshrl.u32 (!%p3358_p6), %v3665_v8, 16  ;;  %v614_v12 = vshll.u32 (!%p3358_p6), %v3665_v8, 16 }
  0x3f   : > { %v605_v13 = vrot.slane (!%p3358_p6), %v603_v9, 7  ;;  %v613_v17 = vrot.slane (!%p3358_p6), %v611_v11, 7 }
  0x41   : > { %v608_v18 = vor.u32 (!%p3358_p6), %v606_v10, %v605_v13  ;;  %v609_v19 = vrot.slane (!%p3358_p6), %v605_v13, 4  ;;  %v616_v22 = vor.u32 (!%p3358_p6), %v614_v12, %v613_v17  ;;  %v617_v23 = vrot.slane (!%p3358_p6), %v613_v17, 4 }
  0x43   : > { %v625_v24 = vsel %vm4626_vm11, %v608_v18, %v624_v15  ;;  %v628_v25 = vsel %vm4495_vm2, %v609_v19, %v627_v16  ;;  %v631_v26 = vsel %vm4626_vm11, %v616_v22, %v630_v20  ;;  %v634_v27 = vsel %vm4495_vm2, %v617_v23, %v633_v21 }
  0x44   : > { %626 = vst [vmem:[#allocation2] sm:$0xf] %v625_v24  ;;  %629 = vst [vmem:[#allocation2 + $0x4] sm:$0x1] %v628_v25 }
  0x45   : > { %632 = vst [vmem:[#allocation2 + $0x8] sm:$0xf] %v631_v26  ;;  %635 = vst [vmem:[#allocation2 + $0xc] sm:$0x1] %v634_v27 }
  0x46 PF: > { %v636_v28 = vld [vmem:[%s4565_s27] sm:$0xff]  ;;  %v637_v31 = vld [vmem:[%s4565_s27 + $0x8] sm:$0xff]  ;;  %v638_v33 = vld [vmem:[%s4565_s27 + $0x10] sm:$0xff]  ;;  %vm697_vm12 = vcmask 388096   ;;  %p3367_p7 = scmp.ne.s32.totalorder %s4340_s12, 1 }
  0x47   : > { %v3666_v30 = vpack.c.bf16 %v636_v28, %v636_v28  ;;  %v3667_v32 = vpack.c.bf16 %v637_v31, %v637_v31  ;;  %v3668_v36 = vpack.c.bf16 %v638_v33, %v638_v33  ;;  %v639_v37 = vld [vmem:[%s4565_s27 + $0x18] sm:$0xff]  ;;  %v699_v42 = vld [vmem:[#allocation2 + $0x10] sm:$0xf]  ;;  %vm4643_vm13 = vmand %vm697_vm12, %vm504_vm3 }
  0x48   : > { %v3669_v40 = vpack.c.bf16 %v639_v37, %v639_v37  ;;  %v702_v46 = vld [vmem:[#allocation2 + $0x14] sm:$0x1]  ;;  %v705_v52 = vld [vmem:[#allocation2 + $0x18] sm:$0xf]  ;;  %v708_v53 = vld [vmem:[#allocation2 + $0x1c] sm:$0x1] }
  0x49   : > { %v657_v34 = vshrl.u32 %v3666_v30, 16  ;;  %v660_v35 = vshll.u32 %v3666_v30, 16  ;;  %v665_v38 = vshrl.u32 %v3667_v32, 16  ;;  %v668_v39 = vshll.u32 %v3667_v32, 16  ;;  %v711_v57 = vld [vmem:[#allocation2 + $0x20] sm:$0xf] }
  0x4a   : > { %v673_v43 = vshrl.u32 %v3668_v36, 16  ;;  %v676_v44 = vshll.u32 %v3668_v36, 16  ;;  %v681_v48 = vshrl.u32 %v3669_v40, 16  ;;  %v684_v49 = vshll.u32 %v3669_v40, 16  ;;  %v714_v58 = vld [vmem:[#allocation2 + $0x24] sm:$0x1] }
  0x4b   : > { %v659_v41 = vrot.slane %v657_v34, 7  ;;  %v667_v47 = vrot.slane %v665_v38, 7  ;;  %v717_v1 = vld [vmem:[#allocation2 + $0x28] sm:$0xf]  ;;  %v720_v2 = vld [vmem:[#allocation2 + $0x2c] sm:$0x1] }
  0x4c   : > { %v675_v54 = vrot.slane %v673_v43, 7  ;;  %v683_v59 = vrot.slane %v681_v48, 7  ;;  %v728_v11 = vld [vmem:[#allocation2 + $0x30] sm:$0xf] (!%p3367_p7)  ;;  %v731_v12 = vld [vmem:[#allocation2 + $0x34] sm:$0x1] (!%p3367_p7) }
  0x4d   : > { %v662_v50 = vor.u32 %v660_v35, %v659_v41  ;;  %v663_v51 = vrot.slane %v659_v41, 4  ;;  %v670_v55 = vor.u32 %v668_v39, %v667_v47  ;;  %v671_v56 = vrot.slane %v667_v47, 4  ;;  %726 = sbr.rel (%p3367_p7) target bundleno = 86 (0x56), region = 68  ;;  %v734_v13 = vld [vmem:[#allocation2 + $0x38] sm:$0xf] (!%p3367_p7) }
  0x4e   : > { %v678_v62 = vor.u32 %v676_v44, %v675_v54  ;;  %v679_v63 = vrot.slane %v675_v54, 4  ;;  %v686_v5 = vor.u32 %v684_v49, %v683_v59  ;;  %v687_v6 = vrot.slane %v683_v59, 4  ;;  %v737_v17 = vld [vmem:[#allocation2 + $0x3c] sm:$0x1] (!%p3367_p7) }
  0x4f   : > { %v700_v60 = vsel %vm4643_vm13, %v662_v50, %v699_v42  ;;  %v703_v61 = vsel %vm4495_vm2, %v663_v51, %v702_v46  ;;  %v706_v3 = vsel %vm4643_vm13, %v670_v55, %v705_v52  ;;  %v709_v4 = vsel %vm4495_vm2, %v671_v56, %v708_v53 }
  0x50   : > { %701 = vst [vmem:[#allocation2 + $0x10] sm:$0xf] %v700_v60  ;;  %704 = vst [vmem:[#allocation2 + $0x14] sm:$0x1] %v703_v61  ;;  %v712_v7 = vsel %vm4643_vm13, %v678_v62, %v711_v57  ;;  %v715_v8 = vsel %vm4495_vm2, %v679_v63, %v714_v58  ;;  %v718_v9 = vsel %vm4643_vm13, %v686_v5, %v717_v1  ;;  %v729_v14 = vsel (!%p3367_p7), %vm4643_vm13, 0, %v728_v11 }
  0x51   : > { %707 = vst [vmem:[#allocation2 + $0x18] sm:$0xf] %v706_v3  ;;  %710 = vst [vmem:[#allocation2 + $0x1c] sm:$0x1] %v709_v4  ;;  %v721_v10 = vsel %vm4495_vm2, %v687_v6, %v720_v2  ;;  %v732_v15 = vsel (!%p3367_p7), %vm4495_vm2, 0, %v731_v12  ;;  %v735_v16 = vsel (!%p3367_p7), %vm4643_vm13, 0, %v734_v13 }
  0x52   : > { %713 = vst [vmem:[#allocation2 + $0x20] sm:$0xf] %v712_v7  ;;  %716 = vst [vmem:[#allocation2 + $0x24] sm:$0x1] %v715_v8  ;;  %v738_v18 = vsel (!%p3367_p7), %vm4495_vm2, 0, %v737_v17 }
  0x53   : > { %719 = vst [vmem:[#allocation2 + $0x28] sm:$0xf] %v718_v9  ;;  %722 = vst [vmem:[#allocation2 + $0x2c] sm:$0x1] %v721_v10 }
  0x54   : > { %730 = vst [vmem:[#allocation2 + $0x30] sm:$0xf] %v729_v14  ;;  %733 = vst [vmem:[#allocation2 + $0x34] sm:$0x1] %v732_v15 }
  0x55   : > { %736 = vst [vmem:[#allocation2 + $0x38] sm:$0xf] %v735_v16  ;;  %739 = vst [vmem:[#allocation2 + $0x3c] sm:$0x1] %v738_v18 }
  0x56 PF: > { %p3368_p9 = scmp.ge.s32.totalorder %s4340_s12, 1 }
  0x57   : > { %v744_v19 = vld [vmem:[%s4609_s21] sm:$0xff] (!%p3368_p9)  ;;  %v745_v21 = vld [vmem:[%s4609_s21 + $0x8] sm:$0xff] (!%p3368_p9) }
  0x58   : > { %743 = sbr.rel (%p3368_p9) target bundleno = 99 (0x63), region = 72  ;;  %v3670_v20 = vpack.c.bf16 (!%p3368_p9), %v744_v19, %v744_v19  ;;  %v3671_v22 = vpack.c.bf16 (!%p3368_p9), %v745_v21, %v745_v21 }
  0x5a   : > { %v755_v23 = vshrl.u32 (!%p3368_p9), %v3670_v20, 16  ;;  %v758_v24 = vshll.u32 (!%p3368_p9), %v3670_v20, 16  ;;  %v763_v25 = vshrl.u32 (!%p3368_p9), %v3671_v22, 16  ;;  %v766_v26 = vshll.u32 (!%p3368_p9), %v3671_v22, 16 }
  0x5c   : > { %v757_v27 = vrot.slane (!%p3368_p9), %v755_v23, 7  ;;  %v765_v31 = vrot.slane (!%p3368_p9), %v763_v25, 7  ;;  %v781_v34 = vld [vmem:[#allocation2 + $0x38] sm:$0xf] (!%p3368_p9)  ;;  %v784_v35 = vld [vmem:[#allocation2 + $0x3c] sm:$0x1] (!%p3368_p9) }
  0x5d   : > { %v775_v28 = vld [vmem:[#allocation2 + $0x30] sm:$0xf] (!%p3368_p9)  ;;  %v778_v30 = vld [vmem:[#allocation2 + $0x34] sm:$0x1] (!%p3368_p9) }
  0x5e   : > { %v760_v32 = vor.u32 (!%p3368_p9), %v758_v24, %v757_v27  ;;  %v761_v33 = vrot.slane (!%p3368_p9), %v757_v27, 4  ;;  %v768_v36 = vor.u32 (!%p3368_p9), %v766_v26, %v765_v31  ;;  %v769_v37 = vrot.slane (!%p3368_p9), %v765_v31, 4 }
  0x60   : > { %v776_v38 = vsel %vm4643_vm13, %v760_v32, %v775_v28  ;;  %v779_v39 = vsel %vm4495_vm2, %v761_v33, %v778_v30  ;;  %v782_v40 = vsel %vm4643_vm13, %v768_v36, %v781_v34  ;;  %v785_v41 = vsel %vm4495_vm2, %v769_v37, %v784_v35 }
  0x61   : > { %777 = vst [vmem:[#allocation2 + $0x30] sm:$0xf] %v776_v38  ;;  %780 = vst [vmem:[#allocation2 + $0x34] sm:$0x1] %v779_v39 }
  0x62   : > { %783 = vst [vmem:[#allocation2 + $0x38] sm:$0xf] %v782_v40  ;;  %786 = vst [vmem:[#allocation2 + $0x3c] sm:$0x1] %v785_v41 }
  0x63 PF: > { %v4184_v42 = vld [vmem:[%s5384_s3 + $0x48] sm:$0xff]   ;;  %v4358_v43 = vmov 0.0   ;;  %v4185_v44 = vld [vmem:[%s5384_s3 + $0x50] sm:$0xff]   ;;  %vm4359_vm14 = vmmov 0   ;;  %v4186_v0 = vld [vmem:[%s5384_s3 + $0x58] sm:$0xff]   ;;  %vm841_vm15 = vcmask 392192  }
  0x64   : > { %3786 = vmatprep.subr.bf16.mxu1 %v4358_v43  ;;  %3894 = vmatprep.subr.bf16.mxu0 %v4358_v43  ;;  %v788_v45 = vld [vmem:[#allocation2 + $0x8] sm:$0xf]  ;;  %v4701_v46 = vld [vmem:[#allocation2 + $0x10] sm:$0xf]  ;;  %v4189_v48 = vld [vmem:[%s5384_s3] sm:$0xff]   ;;  %vm1546_vm0 = vcmask 1042432  }
  0x65   : > { %3787 = vmatpush3.bf16.msra.mxu1 %v4184_v42  ;;  %3792 = vmatprep.mubr.msk.bf16.mxu1 %vm4359_vm14, %v4358_v43  ;;  %v3377_v47 = vcombine.low %v788_v45, %v4701_v46  ;;  %v790_v49 = vld [vmem:[#allocation2 + $0x18] sm:$0xf]  ;;  %v4712_v50 = vld [vmem:[#allocation2 + $0x20] sm:$0xf]  ;;  %v4191_v51 = vld [vmem:[%s5384_s3 + $0x8] sm:$0xff]   ;;  %vm1547_vm1 = vcmask 1046532  }
  0x66   : > { %3788 = vmatprep.subr.bf16.mxu1 %v4358_v43  ;;  %3900 = vmatprep.mubr.msk.bf16.mxu0 %vm4359_vm14, %v4358_v43  ;;  %v3378_v52 = vcombine.low %v790_v49, %v4712_v50  ;;  %v4193_v53 = vld [vmem:[%s5384_s3 + $0x10] sm:$0xff]   ;;  %v4726_v54 = vld [vmem:[#allocation2 + $0x28] sm:$0xf]  ;;  %v787_v57 = vld [vmem:[#allocation2] sm:$0xf]  ;;  %v3387_v24 = vcombine.low %v4701_v46, %v790_v49  ;;  %s4360_s14 = smov 48  }
  0x67   : > { %v4208_v58 = vld [vmem:[%s5384_s3 + $0x30] sm:$0xff]   ;;  %v4210_v60 = vld [vmem:[%s5384_s3 + $0x38] sm:$0xff]   ;;  %v3386_v61 = vcombine.low %v787_v57, %v788_v45  ;;  %v4745_v62 = vld [vmem:[#allocation2 + $0x4] sm:$0x1]  ;;  %vm1107_vm4 = vsmask.f32 3328 }
  0x68   : > { %v4728_v55 = vld [vmem:[#allocation2 + $0x30] sm:$0xf]  ;;  %3895 = vmatpush3.bf16.msra.mxu0 %v4208_v58  ;;  %v4748_v63 = vld [vmem:[#allocation2 + $0xc] sm:$0x1]  ;;  %v4211_v1 = vld [vmem:[%s5384_s3 + $0x40] sm:$0xff]   ;;  %v1551_v8 = vrot.slane %v4745_v62, 5 }
  0x69   : > { %3789 = vmatpush3.bf16.msra.mxu1 %v4185_v44  ;;  %v3379_v56 = vcombine.low %v4726_v54, %v4728_v55  ;;  %v4194_v59 = vld [vmem:[%s5384_s3 + $0x90] sm:$0xff]   ;;  %3896 = vmatprep.subr.bf16.mxu0 %v4358_v43  ;;  %vm4753_vm2 = vmor %vm1546_vm0, %vm1547_vm1  ;;  %v1522_v3 = vld [vmem:[#allocation2] sm:$0xe]  ;;  %vm1108_vm7 = vsmask.f32 7440  ;;  %v1555_v10 = vrot.slane %v4748_v63, 5 }
  0x6a   : > { %3790 = vmatprep.subr.bf16.mxu1 %v4358_v43  ;;  %v4196_v4 = vld [vmem:[%s5384_s3 + $0x98] sm:$0xff]   ;;  %v4760_v5 = vld [vmem:[#allocation2 + $0x14] sm:$0x1]  ;;  %v1523_v6 = vld [vmem:[#allocation2 + $0x8] sm:$0xe]  ;;  %v3451_v7 = vrot.slane %v1522_v3, 9 }
  0x6b   : > { %v3452_v9 = vrot.slane %v1523_v6, 9  ;;  %v4768_v11 = vld [vmem:[#allocation2 + $0x1c] sm:$0x1]  ;;  %v1524_v13 = vld [vmem:[#allocation2 + $0x10] sm:$0xe]  ;;  %v4213_v15 = vld [vmem:[%s5384_s3 + $0xc0] sm:$0xff]  }
  0x6c   : > { %3897 = vmatpush3.bf16.msra.mxu0 %v4210_v60  ;;  %v1552_v12 = vsel %vm4753_vm2, %v3451_v7, %v1551_v8  ;;  %v1525_v16 = vld [vmem:[#allocation2 + $0x18] sm:$0xe]  ;;  %v3453_v17 = vrot.slane %v1524_v13, 9  ;;  %v1559_v18 = vrot.slane %v4760_v5, 5  ;;  %v4198_v19 = vld [vmem:[%s5384_s3 + $0xa0] sm:$0xff]   ;;  %v1563_v23 = vrot.slane %v4768_v11, 5  ;;  %vm4832_vm8 = vmor %vm1107_vm4, %vm1108_vm7 }
  0x6d   : > { %3791 = vmatpush3.bf16.msra.mxu1 %v4186_v0  ;;  %3898 = vmatprep.subr.bf16.mxu0 %v4358_v43  ;;  %v4775_v14 = vsel %vm4753_vm2, %v3452_v9, %v1555_v10  ;;  %v4784_v20 = vld [vmem:[#allocation2 + $0x24] sm:$0x1]  ;;  %v3454_v22 = vrot.slane %v1525_v16, 9  ;;  %v1105_v26 = vld [vmem:[#allocation2 + $0x38] sm:$0xf]  ;;  %v4215_v40 = vld [vmem:[%s5384_s3 + $0xc8] sm:$0xff]  }
  0x6e   : > { %3804 = vmatprep.subr.bf16.mxu1 %v4358_v43  ;;  %v3465_v21 = vcombine.low %v1552_v12, %v4775_v14  ;;  %v4792_v25 = vsel %vm4753_vm2, %v3453_v17, %v1559_v18  ;;  %v4794_v27 = vld [vmem:[#allocation2 + $0x2c] sm:$0x1]  ;;  %v4798_v30 = vld [vmem:[#allocation2 + $0x3c] sm:$0x1]  ;;  %v1209_v31 = vshrl.u32 %v1105_v26, 16  ;;  %v1212_v32 = vshll.u32 %v1105_v26, 16 }
  0x6f   : > { %v3480_v28 = vcombine.low %v4775_v14, %v4792_v25  ;;  %v1526_v33 = vld [vmem:[#allocation2 + $0x20] sm:$0xe]  ;;  %v4801_v34 = vld [vmem:[#allocation2 + $0x34] sm:$0x1]  ;;  %v1218_v35 = vshll.u32 %v4798_v30, 16  ;;  %v1567_v38 = vrot.slane %v4784_v20, 5  ;;  %v4810_v39 = vsel %vm4753_vm2, %v3454_v22, %v1563_v23 }
  0x70   : > { %3793 = vmatmul.mubr.msk.bf16.vlgmr.msra.gmra.mrb[0].mxu1 %vm841_vm15, %v3377_v47  ;;  %3899 = vmatpush3.bf16.msra.mxu0 %v4211_v1  ;;  %v1527_v36 = vld [vmem:[#allocation2 + $0x28] sm:$0xe]  ;;  %v3455_v37 = vrot.slane %v1526_v33, 9  ;;  %v1211_v41 = vrot.slane %v1209_v31, 4  ;;  %v1214_v42 = vrot.slane %v1212_v32, 5  ;;  %v1571_v45 = vrot.slane %v4794_v27, 5 }
  0x71   : > { %3805 = vmatpush3.bf16.msra.mxu1 %v4189_v48  ;;  %3796 = vmatprep.mubr.msk.bf16.mxu1 %vm4359_vm14, %v4358_v43  ;;  %v3456_v0 = vrot.slane %v1527_v36, 9  ;;  %v4824_v47 = vrot.slane %v1218_v35, 5  ;;  %v1528_v49 = vld [vmem:[#allocation2 + $0x30] sm:$0xe]  ;;  %v1093_v6 = vld [vmem:[#allocation2 + $0x8] sm:$0xf] }
  0x72   : > { %3806 = vmatprep.subr.bf16.mxu1 %v4358_v43  ;;  %3930 = vmatprep.subr.bf16.mxu0 %v4358_v43  ;;  %v4819_v44 = vsel %vm4753_vm2, %v3455_v37, %v1567_v38  ;;  %v1215_v46 = vor.u32 %v1214_v42, %v1211_v41  ;;  %v4217_v58 = vld [vmem:[%s5384_s3 + $0xd0] sm:$0xff]   ;;  %v1125_v9 = vshrl.u32 %v1093_v6, 16  ;;  %v1128_v10 = vshll.u32 %v1093_v6, 16  ;;  %v4200_v12 = vld [vmem:[%s5384_s3 + $0x20] sm:$0xff]   ;;  %v4202_v18 = vld [vmem:[%s5384_s3 + $0x28] sm:$0xff]  }
  0x73   : > { %3901 = vmatmul.mubr.msk.bf16.vlgmr.msra.gmra.mrb[0].mxu0 %vm841_vm15, %v3465_v21  ;;  %v3481_v48 = vcombine.low %v4810_v39, %v4819_v44  ;;  %v4847_v60 = vsel %vm4753_vm2, %v3456_v0, %v1571_v45  ;;  %v1097_v21 = vld [vmem:[#allocation2 + $0x18] sm:$0xf]  ;;  %v1120_v23 = vshll.u32 %v4745_v62, 16  ;;  %v1579_v41 = vrot.slane %v4798_v30, 5 }
  0x74   : > { %3931 = vmatpush3.bf16.msra.mxu0 %v4213_v15  ;;  %3904 = vmatprep.mubr.msk.bf16.mxu0 %vm4359_vm14, %v4358_v43  ;;  %v4838_v57 = vrot.slane %v1215_v46, 4  ;;  %v1127_v16 = vrot.slane %v1125_v9, 4  ;;  %v1130_v17 = vrot.slane %v1128_v10, 5  ;;  %v794_v22 = vld [vmem:[#allocation2 + $0x38] sm:$0xf]  ;;  %v1153_v36 = vshrl.u32 %v1097_v21, 16 }
  0x75   : > { %3807 = vmatpush3.bf16.msra.mxu1 %v4191_v51  ;;  %3932 = vmatprep.subr.bf16.mxu0 %v4358_v43  ;;  %v1575_v51 = vrot.slane %v4801_v34, 5  ;;  %v1529_v35 = vld [vmem:[#allocation2 + $0x38] sm:$0xe]  ;;  %v1156_v37 = vshll.u32 %v1097_v21, 16  ;;  %v3401_v62 = vcombine.low %v4728_v55, %v794_v22  ;;  %v1162_v55 = vshll.u32 %v4768_v11, 16 }
  0x76   : > { %3808 = vmatprep.subr.bf16.mxu1 %v4358_v43  ;;  %v1221_v1 = vsel %vm4832_vm8, %v4838_v57, %v4824_v47  ;;  %v1131_v31 = vor.u32 %v1130_v17, %v1127_v16  ;;  %v4203_v16 = vld [vmem:[%s5384_s3 + $0x60] sm:$0xff]  }
  0x78   : > { %3797 = vmatmul.mubr.msk.bf16.gmra.mrb[4].mxu1 %vm841_vm15, %v3378_v52  ;;  %3933 = vmatpush3.bf16.msra.mxu0 %v4215_v40  ;;  %v3458_v40 = vrot.slane %v1529_v35, 9  ;;  %v1132_v0 = vrot.slane %v1131_v31, 4 }
  0x79   : > { %3800 = vmatprep.mubr.msk.bf16.mxu1 %vm4359_vm14, %v4358_v43  ;;  %3809 = vmatpush3.bf16.msra.mxu1 %v4193_v53  ;;  %v3466_v53 = vcombine.low %v4792_v25, %v4810_v39  ;;  %v4218_v39 = vld [vmem:[%s5386_s5] sm:$0xff]  }
  0x7a   : > { %3822 = vmatprep.subr.bf16.mxu1 %v4358_v43  ;;  %3934 = vmatprep.subr.bf16.mxu0 %v4358_v43  ;;  %v1580_v30 = vsel %vm4753_vm2, %v3458_v40, %v1579_v41  ;;  %v1103_v41 = vld [vmem:[#allocation2 + $0x30] sm:$0xf] }
  0x7b   : > { %3905 = vmatmul.mubr.msk.bf16.gmra.mrb[4].mxu0 %vm841_vm15, %v3466_v53 }
  0x7c   : > { %3908 = vmatprep.mubr.msk.bf16.mxu0 %vm4359_vm14, %v4358_v43  ;;  %3935 = vmatpush3.bf16.msra.mxu0 %v4217_v58  ;;  %v1148_v58 = vshll.u32 %v4760_v5, 16 }
  0x7e   : > { %v1150_v9 = vrot.slane %v1148_v58, 5  ;;  %v1204_v58 = vshll.u32 %v4801_v34, 16 }
  0x80   : > { %3801 = vmatmul.mubr.msk.bf16.gmra.mrb[8].mxu1 %vm841_vm15, %v3379_v56  ;;  %v3457_v56 = vrot.slane %v1528_v49, 9  ;;  %v1155_v49 = vrot.slane %v1153_v36, 4 }
  0x81   : > { %3810 = vmatprep.mubr.msk.bf16.mxu1 %vm4359_vm14, %v4358_v43 }
  0x88   : > { %3811 = vmatmul.mubr.msk.bf16.vlgmr.msra.gmra.mrb[12].mxu1 %vm841_vm15, %v3386_v61  ;;  %v4852_v61 = vsel %vm4753_vm2, %v3457_v56, %v1575_v51  ;;  %v1158_v51 = vrot.slane %v1156_v37, 5  ;;  %v1101_v56 = vld [vmem:[#allocation2 + $0x28] sm:$0xf] }
  0x89   : > { %3823 = vmatpush3.bf16.msra.mxu1 %v4194_v59  ;;  %3814 = vmatprep.mubr.msk.bf16.mxu1 %vm4359_vm14, %v4358_v43  ;;  %v3388_v59 = vcombine.low %v4712_v50, %v4726_v54  ;;  %v3482_v3 = vcombine.low %v4847_v60, %v4852_v61  ;;  %v3467_v50 = vcombine.low %v4819_v44, %v4847_v60  ;;  %v4199_v54 = vld [vmem:[%s5384_s3 + $0x18] sm:$0xff]   ;;  %v1181_v6 = vshrl.u32 %v1101_v56, 16 }
  0x8a   : > { %3824 = vmatprep.subr.bf16.mxu1 %v4358_v43  ;;  %v1159_v5 = vor.u32 %v1158_v51, %v1155_v49 }
  0x8b   : > { %3909 = vmatmul.mubr.msk.bf16.gmra.mrb[8].mxu0 %vm841_vm15, %v3467_v50 }
  0x8c   : > { %3936 = vmatprep.mubr.msk.bf16.mxu0 %vm4359_vm14, %v4358_v43  ;;  %v1160_v17 = vrot.slane %v1159_v5, 4  ;;  %v4214_v5 = vld [vmem:[%s5384_s3 + $0x80] sm:$0xff]  }
  0x8d   : > { %3825 = vmatpush3.bf16.msra.mxu1 %v4196_v4  ;;  %v1091_v4 = vld [vmem:[#allocation2] sm:$0xf] }
  0x8e   : > { %3826 = vmatprep.subr.bf16.mxu1 %v4358_v43  ;;  %v1111_v7 = vshrl.u32 %v1091_v4, 16  ;;  %v1114_v8 = vshll.u32 %v1091_v4, 16 }
  0x90   : > { %3815 = vmatmul.mubr.msk.bf16.gmra.mrb[16].mxu1 %vm841_vm15, %v3387_v24  ;;  %v1113_v13 = vrot.slane %v1111_v7, 4  ;;  %v1116_v15 = vrot.slane %v1114_v8, 5  ;;  %v1184_v7 = vshll.u32 %v1101_v56, 16  ;;  %v3495_v8 = vcombine.low %v4852_v61, %v1580_v30  ;;  %v4219_v61 = vld [vmem:[%s5386_s5 + $0x8] sm:$0xff]  }
  0x91   : > { %3818 = vmatprep.mubr.msk.bf16.mxu1 %vm4359_vm14, %v4358_v43  ;;  %3827 = vmatpush3.bf16.msra.mxu1 %v4198_v19  ;;  %v1095_v19 = vld [vmem:[#allocation2 + $0x10] sm:$0xf] }
  0x92   : > { %3840 = vmatprep.subr.bf16.mxu1 %v4358_v43  ;;  %v1117_v26 = vor.u32 %v1116_v15, %v1113_v13  ;;  %v1139_v32 = vshrl.u32 %v1095_v19, 16  ;;  %v1142_v33 = vshll.u32 %v1095_v19, 16  ;;  %v1164_v13 = vrot.slane %v1162_v55, 5 }
  0x93   : > { %3937 = vmatmul.mubr.msk.bf16.vlgmr.msra.gmra.mrb[12].mxu0 %vm841_vm15, %v3466_v53  ;;  %v1099_v53 = vld [vmem:[#allocation2 + $0x20] sm:$0xf]  ;;  %v1183_v19 = vrot.slane %v1181_v6, 4  ;;  %v1186_v21 = vrot.slane %v1184_v7, 5 }
  0x94   : > { %3940 = vmatprep.mubr.msk.bf16.mxu0 %vm4359_vm14, %v4358_v43  ;;  %v1118_v42 = vrot.slane %v1117_v26, 4  ;;  %v1141_v45 = vrot.slane %v1139_v32, 4  ;;  %v1144_v46 = vrot.slane %v1142_v33, 5  ;;  %v1170_v11 = vshll.u32 %v1099_v53, 16  ;;  %v4204_v26 = vld [vmem:[%s5384_s3 + $0x68] sm:$0xff]  }
  0x95   : > { %v1187_v32 = vor.u32 %v1186_v21, %v1183_v19  ;;  %v1190_v33 = vshll.u32 %v4794_v27, 16 }
  0x96   : > { %v1145_v4 = vor.u32 %v1144_v46, %v1141_v45  ;;  %v4206_v46 = vld [vmem:[%s5384_s3 + $0xa8] sm:$0xff]  }
  0x97   : > { %v1188_v37 = vrot.slane %v1187_v32, 4 }
  0x98   : > { %3819 = vmatmul.mubr.msk.bf16.gmra.mrb[20].mxu1 %vm841_vm15, %v3388_v59 }
  0x99   : > { %3828 = vmatprep.mubr.msk.bf16.mxu1 %vm4359_vm14, %v4358_v43 }
  0x9b   : > { %3941 = vmatmul.mubr.msk.bf16.gmra.mrb[16].mxu0 %vm841_vm15, %v3467_v50  ;;  %v1167_v50 = vshrl.u32 %v1099_v53, 16  ;;  %v4207_v53 = vld [vmem:[%s5384_s3 + $0xb0] sm:$0xff]  }
  0x9c   : > { %3944 = vmatprep.mubr.msk.bf16.mxu0 %vm4359_vm14, %v4358_v43 }
  0x9d   : > { %v1169_v15 = vrot.slane %v1167_v50, 4  ;;  %v4212_v50 = vld [vmem:[%s5384_s3 + $0x78] sm:$0xff]  }
  0xa0   : > { %3829 = vmatmul.mubr.msk.bf16.vlgmr.msra.gmra.mrb[24].mxu1 %vm841_vm15, %v3387_v24  ;;  %v1134_v24 = vshll.u32 %v4748_v63, 16  ;;  %v1122_v63 = vrot.slane %v1120_v23, 5  ;;  %v1176_v23 = vshll.u32 %v4784_v20, 16 }
  0xa1   : > { %3841 = vmatpush3.bf16.msra.mxu1 %v4199_v54  ;;  %3832 = vmatprep.mubr.msk.bf16.mxu1 %vm4359_vm14, %v4358_v43 }
  0xa2   : > { %3842 = vmatprep.subr.bf16.mxu1 %v4358_v43  ;;  %v1136_v38 = vrot.slane %v1134_v24, 5  ;;  %v1165_v24 = vsel %vm4832_vm8, %v1160_v17, %v1164_v13  ;;  %v1178_v36 = vrot.slane %v1176_v23, 5  ;;  %v4220_v13 = vld [vmem:[%s5386_s5 + $0x10] sm:$0xff]  }
  0xa3   : > { %3945 = vmatmul.mubr.msk.bf16.gmra.mrb[20].mxu0 %vm841_vm15, %v3495_v8 }
  0xa4   : > { %v1137_v54 = vsel %vm4832_vm8, %v1132_v0, %v1136_v38  ;;  %v1198_v0 = vshll.u32 %v1103_v41, 16 }
  0xa5   : > { %3843 = vmatpush3.bf16.msra.mxu1 %v4200_v12  ;;  %v1146_v12 = vrot.slane %v1145_v4, 4 }
  0xa6   : > { %3844 = vmatprep.subr.bf16.mxu1 %v4358_v43  ;;  %v1200_v51 = vrot.slane %v1198_v0, 5 }
  0xa7   : > { %v1151_v22 = vsel %vm4832_vm8, %v1146_v12, %v1150_v9 }
  0xa8   : > { %3833 = vmatmul.mubr.msk.bf16.gmra.mrb[28].mxu1 %vm841_vm15, %v3388_v59  ;;  %v1123_v59 = vsel %vm4832_vm8, %v1118_v42, %v1122_v63  ;;  %v3415_v35 = vcombine.low %v1151_v22, %v1165_v24  ;;  %v4205_v63 = vld [vmem:[%s5384_s3 + $0x70] sm:$0xff]   ;;  %v1195_v42 = vshrl.u32 %v1103_v41, 16  ;;  %v3429_v45 = vcombine.low %v1137_v54, %v1151_v22 }
  0xa9   : > { %3836 = vmatprep.mubr.msk.bf16.mxu1 %vm4359_vm14, %v4358_v43  ;;  %3845 = vmatpush3.bf16.msra.mxu1 %v4202_v18  ;;  %v3414_v10 = vcombine.low %v1123_v59, %v1137_v54  ;;  %v1172_v18 = vrot.slane %v1170_v11, 5  ;;  %v1206_v59 = vrot.slane %v1204_v58, 5  ;;  %v4209_v54 = vld [vmem:[%s5384_s3 + $0xb8] sm:$0xff]   ;;  %v4216_v11 = vld [vmem:[%s5384_s3 + $0x88] sm:$0xff]  }
  0xaa   : > { %3858 = vmatprep.subr.bf16.mxu1 %v4358_v43  ;;  %v1197_v49 = vrot.slane %v1195_v42, 4 }
  0xab   : > { %v1173_v31 = vor.u32 %v1172_v18, %v1169_v15 }
  0xac   : > { %v1201_v56 = vor.u32 %v1200_v51, %v1197_v49 }
  0xad   : > { %v1174_v20 = vrot.slane %v1173_v31, 4 }
  0xae   : > { %v1202_v30 = vrot.slane %v1201_v56, 4 }
  0xaf   : > { %v1179_v27 = vsel %vm4832_vm8, %v1174_v20, %v1178_v36 }
  0xb0   : > { %3837 = vmatmul.mubr.msk.bf16.gmra.mrb[32].mxu1 %vm841_vm15, %v3401_v62  ;;  %v1192_v62 = vrot.slane %v1190_v33, 5  ;;  %v3430_v55 = vcombine.low %v1165_v24, %v1179_v27  ;;  %v1207_v34 = vsel %vm4832_vm8, %v1202_v30, %v1206_v59 }
  0xb1   : > { %3846 = vmatprep.mubr.msk.bf16.mxu1 %vm4359_vm14, %v4358_v43  ;;  %v3444_v6 = vcombine.low %v1207_v34, %v1221_v1 }
  0xb2   : > { %v1193_v38 = vsel %vm4832_vm8, %v1188_v37, %v1192_v62 }
  0xb3   : > { %v3416_v40 = vcombine.low %v1179_v27, %v1193_v38  ;;  %v3431_v4 = vcombine.low %v1193_v38, %v1207_v34 }
  0xb8   : > { %3847 = vmatmul.mubr.msk.bf16.vlgmr.msra.gmra.mrb[36].mxu1 %vm841_vm15, %v3414_v10 }
  0xb9   : > { %3859 = vmatpush3.bf16.msra.mxu1 %v4203_v16  ;;  %3850 = vmatprep.mubr.msk.bf16.mxu1 %vm4359_vm14, %v4358_v43 }
  0xba   : > { %3860 = vmatprep.subr.bf16.mxu1 %v4358_v43 }
  0xbd   : > { %3861 = vmatpush3.bf16.msra.mxu1 %v4204_v26 }
  0xbe   : > { %3862 = vmatprep.subr.bf16.mxu1 %v4358_v43 }
  0xc0   : > { %3851 = vmatmul.mubr.msk.bf16.gmra.mrb[40].mxu1 %vm841_vm15, %v3415_v35 }
  0xc1   : > { %3854 = vmatprep.mubr.msk.bf16.mxu1 %vm4359_vm14, %v4358_v43  ;;  %3863 = vmatpush3.bf16.msra.mxu1 %v4205_v63 }
  0xc2   : > { %3876 = vmatprep.subr.bf16.mxu1 %v4358_v43 }
  0xc8   : > { %3855 = vmatmul.mubr.msk.bf16.gmra.mrb[44].mxu1 %vm841_vm15, %v3416_v40 }
  0xc9   : > { %3864 = vmatprep.mubr.msk.bf16.mxu1 %vm4359_vm14, %v4358_v43 }
  0xd0   : > { %3865 = vmatmul.mubr.msk.bf16.vlgmr.msra.gmra.mrb[48].mxu1 %vm841_vm15, %v3429_v45 }
  0xd1   : > { %3877 = vmatpush3.bf16.msra.mxu1 %v4206_v46  ;;  %3868 = vmatprep.mubr.msk.bf16.mxu1 %vm4359_vm14, %v4358_v43 }
  0xd2   : > { %3878 = vmatprep.subr.bf16.mxu1 %v4358_v43 }
  0xd5   : > { %3879 = vmatpush3.bf16.msra.mxu1 %v4207_v53 }
  0xd6   : > { %3880 = vmatprep.subr.bf16.mxu1 %v4358_v43 }
  0xd8   : > { %3869 = vmatmul.mubr.msk.bf16.gmra.mrb[52].mxu1 %vm841_vm15, %v3430_v55 }
  0xd9   : > { %3872 = vmatprep.mubr.msk.bf16.mxu1 %vm4359_vm14, %v4358_v43  ;;  %3881 = vmatpush3.bf16.msra.mxu1 %v4209_v54 }
  0xda   : > { %3912 = vmatprep.subr.bf16.mxu1 %v4358_v43 }
  0xe0   : > { %3873 = vmatmul.mubr.msk.bf16.gmra.mrb[56].mxu1 %vm841_vm15, %v3431_v4 }
  0xe1   : > { %3882 = vmatprep.mubr.msk.bf16.mxu1 %vm4359_vm14, %v4358_v43 }
  0xe8   : > { %3883 = vmatmul.mubr.msk.bf16.vlgmr.msra.gmra.mrb[60].mxu1 %vm841_vm15, %v3415_v35 }
  0xe9   : > { %3913 = vmatpush3.bf16.msra.mxu1 %v4212_v50  ;;  %3886 = vmatprep.mubr.msk.bf16.mxu1 %vm4359_vm14, %v4358_v43 }
  0xea   : > { %3914 = vmatprep.subr.bf16.mxu1 %v4358_v43 }
  0xed   : > { %3915 = vmatpush3.bf16.msra.mxu1 %v4214_v5 }
  0xee   : > { %3916 = vmatprep.subr.bf16.mxu1 %v4358_v43 }
  0xf0   : > { %3887 = vmatmul.mubr.msk.bf16.gmra.mrb[64].mxu1 %vm841_vm15, %v3416_v40 }
  0xf1   : > { %3890 = vmatprep.mubr.msk.bf16.mxu1 %vm4359_vm14, %v4358_v43  ;;  %3917 = vmatpush3.bf16.msra.mxu1 %v4216_v11 }
  0xf2   : > { %3948 = vmatprep.subr.bf16.mxu1 %v4358_v43 }
  0xf8   : > { %3891 = vmatmul.mubr.msk.bf16.gmra.mrb[68].mxu1 %vm841_vm15, %v3444_v6 }
  0xf9   : > { %3918 = vmatprep.mubr.msk.bf16.mxu1 %vm4359_vm14, %v4358_v43 }
 0x100   : > { %3919 = vmatmul.mubr.msk.bf16.vlgmr.msra.gmra.mrb[72].mxu1 %vm841_vm15, %v3480_v28 }
 0x101   : > { %3922 = vmatprep.mubr.msk.bf16.mxu1 %vm4359_vm14, %v4358_v43  ;;  %3949 = vmatpush3.bf16.msra.mxu1 %v4218_v39 }
 0x102   : > { %3950 = vmatprep.subr.bf16.mxu1 %v4358_v43 }
 0x105   : > { %3951 = vmatpush3.bf16.msra.mxu1 %v4219_v61 }
 0x106   : > { %3952 = vmatprep.subr.bf16.mxu1 %v4358_v43 }
 0x108   : > { %3923 = vmatmul.mubr.msk.bf16.gmra.mrb[76].mxu1 %vm841_vm15, %v3481_v48 }
 0x109   : > { %3926 = vmatprep.mubr.msk.bf16.mxu1 %vm4359_vm14, %v4358_v43  ;;  %3953 = vmatpush3.bf16.msra.mxu1 %v4220_v13 }
 0x110   : > { %3927 = vmatmul.mubr.msk.bf16.gmra.mrb[80].mxu1 %vm841_vm15, %v3482_v3 }
 0x111   : > { %3954 = vmatprep.mubr.msk.bf16.mxu1 %vm4359_vm14, %v4358_v43 }
 0x143   : > { %v885_v14 = vpop.f32.mrb[0].mxu1 }
 0x144   : > { %v3794_v25 = vpop.f32.mrb[1].mxu1 }
 0x145   : > { %v888_v28 = vpop.f32.mrb[2].mxu1 }
 0x146   : > { %v3795_v47 = vpop.f32.mrb[3].mxu1  ;;  %v5022_v18 = vpop.f32.mrb[0].mxu0 }
 0x147   : > { %v3902_v19 = vpop.f32.mrb[1].mxu0 }
 0x148   : > { %v5024_v22 = vpop.f32.mrb[2].mxu0 }
 0x149   : > { %v3903_v26 = vpop.f32.mrb[3].mxu0 }
 0x14b   : > { %v893_v44 = vpop.f32.mrb[4].mxu1 }
 0x14c   : > { %v3798_v48 = vpop.f32.mrb[5].mxu1 }
 0x14d   : > { %v896_v57 = vpop.f32.mrb[6].mxu1 }
 0x14e   : > { %v3799_v60 = vpop.f32.mrb[7].mxu1  ;;  %v5026_v35 = vpop.f32.mrb[4].mxu0 }
 0x14f   : > { %v3906_v20 = vpop.f32.mrb[5].mxu0 }
 0x150   : > { %v5028_v37 = vpop.f32.mrb[6].mxu0 }
 0x151   : > { %v3907_v27 = vpop.f32.mrb[7].mxu0 }
 0x153   : > { %v901_v1 = vpop.f32.mrb[8].mxu1 }
 0x154   : > { %v3802_v3 = vpop.f32.mrb[9].mxu1 }
 0x155   : > { %v904_v7 = vpop.f32.mrb[10].mxu1 }
 0x156   : > { %v3803_v8 = vpop.f32.mrb[11].mxu1 }
 0x15b   : > { %v974_v9 = vpop.f32.mrb[12].mxu1 }
 0x15c   : > { %v975_v10 = vadd.f32 %v974_v9, %v885_v14  ;;  %v3812_v12 = vpop.f32.mrb[13].mxu1 }
 0x15d   : > { %v977_v15 = vpop.f32.mrb[14].mxu1 }
 0x15e   : > { %v978_v16 = vadd.f32 %v977_v15, %v888_v28  ;;  %v3813_v17 = vpop.f32.mrb[15].mxu1  ;;  %v5030_v42 = vpop.f32.mrb[8].mxu0 }
 0x15f   : > { %v3910_v0 = vpop.f32.mrb[9].mxu0 }
 0x160   : > { %v5032_v46 = vpop.f32.mrb[10].mxu0 }
 0x161   : > { %v3911_v53 = vpop.f32.mrb[11].mxu0 }
 0x163   : > { %v982_v21 = vpop.f32.mrb[16].mxu1 }
 0x164   : > { %v983_v23 = vadd.f32 %v982_v21, %v893_v44  ;;  %v3816_v24 = vpop.f32.mrb[17].mxu1 }
 0x165   : > { %v985_v31 = vpop.f32.mrb[18].mxu1 }
 0x166   : > { %v986_v32 = vadd.f32 %v985_v31, %v896_v57  ;;  %v3817_v33 = vpop.f32.mrb[19].mxu1  ;;  %v5034_v30 = vpop.f32.mrb[12].mxu0 }
 0x167   : > { %v3938_v59 = vpop.f32.mrb[13].mxu0 }
 0x168   : > { %v5036_v34 = vpop.f32.mrb[14].mxu0 }
 0x169   : > { %v3939_v5 = vpop.f32.mrb[15].mxu0 }
 0x16b   : > { %v990_v36 = vpop.f32.mrb[20].mxu1 }
 0x16c   : > { %v991_v62 = vadd.f32 %v990_v36, %v901_v1  ;;  %v3820_v63 = vpop.f32.mrb[21].mxu1 }
 0x16d   : > { %v993_v38 = vpop.f32.mrb[22].mxu1 }
 0x16e   : > { %v994_v40 = vadd.f32 %v993_v38, %v904_v7  ;;  %v3821_v41 = vpop.f32.mrb[23].mxu1  ;;  %v5038_v25 = vpop.f32.mrb[16].mxu0 }
 0x16f   : > { %v3942_v28 = vpop.f32.mrb[17].mxu0 }
 0x170   : > { %v5040_v39 = vpop.f32.mrb[18].mxu0 }
 0x171   : > { %v3943_v57 = vpop.f32.mrb[19].mxu0 }
 0x173   : > { %v1062_v45 = vpop.f32.mrb[24].mxu1 }
 0x174   : > { %v1085_v49 = vadd.f32 %v1062_v45, %v975_v10  ;;  %v3830_v51 = vpop.f32.mrb[25].mxu1 }
 0x175   : > { %v1065_v56 = vpop.f32.mrb[26].mxu1 }
 0x176   : > { %v1086_v58 = vadd.f32 %v1065_v56, %v978_v16  ;;  %v3831_v55 = vpop.f32.mrb[27].mxu1  ;;  %v5042_v3 = vpop.f32.mrb[20].mxu0 }
 0x177   : > { %v3946_v7 = vpop.f32.mrb[21].mxu0 }
 0x178   : > { %v5044_v9 = vpop.f32.mrb[22].mxu0 }
 0x179   : > { %v3947_v13 = vpop.f32.mrb[23].mxu0 }
 0x17b   : > { %v1070_v54 = vpop.f32.mrb[28].mxu1 }
 0x17c   : > { %v1087_v4 = vadd.f32 %v1070_v54, %v983_v23  ;;  %v3834_v50 = vpop.f32.mrb[29].mxu1 }
 0x17d   : > { %v1073_v11 = vpop.f32.mrb[30].mxu1 }
 0x17e   : > { %v1088_v6 = vadd.f32 %v1073_v11, %v986_v32  ;;  %v3835_v14 = vpop.f32.mrb[31].mxu1 }
 0x183   : > { %v1078_v47 = vpop.f32.mrb[32].mxu1 }
 0x184   : > { %v1089_v44 = vadd.f32 %v1078_v47, %v991_v62  ;;  %v3838_v48 = vpop.f32.mrb[33].mxu1 }
 0x185   : > { %v1081_v60 = vpop.f32.mrb[34].mxu1 }
 0x186   : > { %v1090_v61 = vadd.f32 %v1081_v60, %v994_v40  ;;  %v3839_v1 = vpop.f32.mrb[35].mxu1 }
 0x18b   : > { %v1299_v8 = vpop.f32.mrb[36].mxu1 }
 0x18c   : > { %v1322_v10 = vadd.f32 %v1299_v8, %v1085_v49  ;;  %v3848_v12 = vpop.f32.mrb[37].mxu1 }
 0x18d   : > { %v1302_v15 = vpop.f32.mrb[38].mxu1 }
 0x18e   : > { %v1323_v16 = vadd.f32 %v1302_v15, %v1086_v58  ;;  %v3849_v17 = vpop.f32.mrb[39].mxu1 }
 0x193   : > { %v1307_v19 = vpop.f32.mrb[40].mxu1 }
 0x194   : > { %v1324_v21 = vadd.f32 %v1307_v19, %v1087_v4  ;;  %v3852_v23 = vpop.f32.mrb[41].mxu1 }
 0x195   : > { %v1310_v24 = vpop.f32.mrb[42].mxu1 }
 0x196   : > { %v1325_v26 = vadd.f32 %v1310_v24, %v1088_v6  ;;  %v3853_v31 = vpop.f32.mrb[43].mxu1 }
 0x19b   : > { %v1315_v32 = vpop.f32.mrb[44].mxu1 }
 0x19c   : > { %v1326_v33 = vadd.f32 %v1315_v32, %v1089_v44  ;;  %v3856_v20 = vpop.f32.mrb[45].mxu1 }
 0x19d   : > { %v1318_v36 = vpop.f32.mrb[46].mxu1 }
 0x19e   : > { %v1327_v62 = vadd.f32 %v1318_v36, %v1090_v61  ;;  %v3857_v63 = vpop.f32.mrb[47].mxu1 }
 0x1a3   : > { %v1400_v27 = vpop.f32.mrb[48].mxu1 }
 0x1a4   : > { %v1423_v38 = vadd.f32 %v1400_v27, %v1322_v10  ;;  %v3866_v40 = vpop.f32.mrb[49].mxu1 }
 0x1a5   : > { %v1403_v41 = vpop.f32.mrb[50].mxu1 }
 0x1a6   : > { %v1424_v0 = vadd.f32 %v1403_v41, %v1323_v16  ;;  %v3867_v45 = vpop.f32.mrb[51].mxu1 }
 0x1ab   : > { %v1408_v49 = vpop.f32.mrb[52].mxu1 }
 0x1ac   : > { %v1425_v51 = vadd.f32 %v1408_v49, %v1324_v21  ;;  %v3870_v53 = vpop.f32.mrb[53].mxu1 }
 0x1ad   : > { %v1411_v56 = vpop.f32.mrb[54].mxu1 }
 0x1ae   : > { %v1426_v58 = vadd.f32 %v1411_v56, %v1325_v26  ;;  %v3871_v55 = vpop.f32.mrb[55].mxu1 }
 0x1b3   : > { %v1416_v59 = vpop.f32.mrb[56].mxu1 }
 0x1b4   : > { %v1427_v54 = vadd.f32 %v1416_v59, %v1326_v33  ;;  %v3874_v4 = vpop.f32.mrb[57].mxu1 }
 0x1b5   : > { %v1419_v50 = vpop.f32.mrb[58].mxu1 }
 0x1b6   : > { %v1428_v5 = vadd.f32 %v1419_v50, %v1327_v62  ;;  %v3875_v11 = vpop.f32.mrb[59].mxu1 }
 0x1bb   : > { %v1493_v6 = vpop.f32.mrb[60].mxu1 }
 0x1bc   : > { %v1516_v14 = vadd.f32 %v1493_v6, %v1423_v38  ;;  %v3884_v28 = vpop.f32.mrb[61].mxu1 }
 0x1bd   : > { %v1496_v47 = vpop.f32.mrb[62].mxu1 }
 0x1be   : > { %v1681_v44 = vadd.f32 %v5022_v18, %v1516_v14  ;;  %v1517_v48 = vadd.f32 %v1496_v47, %v1424_v0  ;;  %v3885_v57 = vpop.f32.mrb[63].mxu1 }
 0x1c0   : > { %v1682_v60 = vadd.f32 %v5024_v22, %v1517_v48 }
 0x1c3   : > { %v1501_v61 = vpop.f32.mrb[64].mxu1 }
 0x1c4   : > { %v1518_v1 = vadd.f32 %v1501_v61, %v1425_v51  ;;  %v3888_v7 = vpop.f32.mrb[65].mxu1 }
 0x1c5   : > { %v1504_v8 = vpop.f32.mrb[66].mxu1 }
 0x1c6   : > { %v1683_v10 = vadd.f32 %v5026_v35, %v1518_v1  ;;  %v1519_v12 = vadd.f32 %v1504_v8, %v1426_v58  ;;  %v3889_v13 = vpop.f32.mrb[67].mxu1  ;;  %v3502_v35 = vld [vmem:[%s5385_s4] ss:$0 sm:$0xff] }
 0x1c8   : > { %v1684_v15 = vadd.f32 %v5028_v37, %v1519_v12 }
 0x1cb   : > { %v1509_v16 = vpop.f32.mrb[68].mxu1 }
 0x1cc   : > { %v1520_v17 = vadd.f32 %v1509_v16, %v1427_v54  ;;  %v3892_v19 = vpop.f32.mrb[69].mxu1 }
 0x1cd   : > { %v1512_v21 = vpop.f32.mrb[70].mxu1 }
 0x1ce   : > { %v1685_v18 = vadd.f32 %v5030_v42, %v1520_v17  ;;  %v1521_v23 = vadd.f32 %v1512_v21, %v1428_v5  ;;  %v3893_v24 = vpop.f32.mrb[71].mxu1 }
 0x1d0   : > { %v1686_v22 = vadd.f32 %v5032_v46, %v1521_v23 }
 0x1d3   : > { %v1759_v26 = vpop.f32.mrb[72].mxu1 }
 0x1d4   : > { %v1782_v31 = vadd.f32 %v1759_v26, %v1681_v44  ;;  %v3920_v32 = vpop.f32.mrb[73].mxu1 }
 0x1d5   : > { %v1762_v33 = vpop.f32.mrb[74].mxu1 }
 0x1d6   : > { %v1875_v37 = vadd.f32 %v5034_v30, %v1782_v31  ;;  %v1783_v20 = vadd.f32 %v1762_v33, %v1682_v60  ;;  %v3921_v36 = vpop.f32.mrb[75].mxu1 }
 0x1d8   : > { %v1888_v62 = vadd.f32 %v3502_v35, %v1875_v37  ;;  %v1876_v63 = vadd.f32 %v5036_v34, %v1783_v20 }
 0x1da   : > { %v1900_v42 = vmul.f32 0.2, %v1888_v62  ;;  %v1889_v27 = vadd.f32 %v3502_v35, %v1876_v63  ;;  %vm1894_vm9 = vcmp.ge.f32.partialorder %v1888_v62, 0.0 }
 0x1db   : > { %v1767_v38 = vpop.f32.mrb[76].mxu1 }
 0x1dc   : > { %vm1895_vm10 = vcmp.ge.f32.partialorder %v1889_v27, 0.0  ;;  %v1901_v46 = vmul.f32 0.2, %v1889_v27  ;;  %v1784_v40 = vadd.f32 %v1767_v38, %v1683_v10  ;;  %v3924_v41 = vpop.f32.mrb[77].mxu1  ;;  %v1906_v45 = vsel %vm1894_vm9, %v1888_v62, %v1900_v42 }
 0x1dd   : > { %v1770_v0 = vpop.f32.mrb[78].mxu1 }
 0x1de   : > { %v1907_v49 = vsel %vm1895_vm10, %v1889_v27, %v1901_v46  ;;  %v1877_v51 = vadd.f32 %v5038_v25, %v1784_v40  ;;  %v1785_v53 = vadd.f32 %v1770_v0, %v1684_v15  ;;  %v3925_v30 = vpop.f32.mrb[79].mxu1 }
 0x1df   : > { %v5058_v56 = vpack.c.bf16 %v1907_v49, %v1906_v45 }
 0x1e0   : > { %v1890_v58 = vadd.f32 %v3502_v35, %v1877_v51  ;;  %v1878_v34 = vadd.f32 %v5040_v39, %v1785_v53 }
 0x1e1   : > { %3955 = vmatmul.mubr.msk.bf16.vlgmr.msra.gmra.mrb[84].mxu1 %vm841_vm15, %v5058_v56 }
 0x1e2   : > { %v1902_v55 = vmul.f32 0.2, %v1890_v58  ;;  %v1891_v59 = vadd.f32 %v3502_v35, %v1878_v34  ;;  %3958 = vmatprep.mubr.msk.bf16.mxu1 %vm4359_vm14, %v4358_v43  ;;  %vm1896_vm11 = vcmp.ge.f32.partialorder %v1890_v58, 0.0 }
 0x1e3   : > { %v1775_v54 = vpop.f32.mrb[80].mxu1 }
 0x1e4   : > { %vm1897_vm12 = vcmp.ge.f32.partialorder %v1891_v59, 0.0  ;;  %v1903_v4 = vmul.f32 0.2, %v1891_v59  ;;  %v1786_v25 = vadd.f32 %v1775_v54, %v1685_v18  ;;  %v3928_v50 = vpop.f32.mrb[81].mxu1  ;;  %v1908_v11 = vsel %vm1896_vm11, %v1890_v58, %v1902_v55  ;;  %v2128_v54 = vld [vmem:[#allocation3 + $0x4] sm:$0x1] }
 0x1e5   : > { %v1778_v5 = vpop.f32.mrb[82].mxu1  ;;  %vm2123_vm11 = vcmask 519168  }
 0x1e6   : > { %v1909_v6 = vsel %vm1897_vm12, %v1891_v59, %v1903_v4  ;;  %v1879_v14 = vadd.f32 %v5042_v3, %v1786_v25  ;;  %v1787_v39 = vadd.f32 %v1778_v5, %v1686_v22  ;;  %v3929_v28 = vpop.f32.mrb[83].mxu1  ;;  %v2125_v59 = vld [vmem:[#allocation3] sm:$0xf]  ;;  %vm5084_vm12 = vmand %vm2123_vm11, %vm504_vm3 }
 0x1e7   : > { %v5066_v47 = vpack.c.bf16 %v1909_v6, %v1908_v11  ;;  %v2131_v6 = vld [vmem:[#allocation3 + $0x8] sm:$0xf] }
 0x1e8   : > { %v1892_v44 = vadd.f32 %v3502_v35, %v1879_v14  ;;  %v1880_v48 = vadd.f32 %v5044_v9, %v1787_v39  ;;  %v3503_v9 = vld [vmem:[%s5387_s6] ss:$0 sm:$0xff]  ;;  %v2134_v14 = vld [vmem:[#allocation3 + $0xc] sm:$0x1] }
 0x1e9   : > { %3959 = vmatmul.mubr.msk.bf16.gmra.mrb[88].mxu1 %vm841_vm15, %v5066_v47 }
 0x1ea   : > { %v1904_v57 = vmul.f32 0.2, %v1892_v44  ;;  %v1893_v60 = vadd.f32 %v3502_v35, %v1880_v48  ;;  %3962 = vmatprep.mubr.msk.bf16.mxu1 %vm4359_vm14, %v4358_v43  ;;  %vm1898_vm13 = vcmp.ge.f32.partialorder %v1892_v44, 0.0 }
 0x1ec   : > { %vm1899_vm0 = vcmp.ge.f32.partialorder %v1893_v60, 0.0  ;;  %v1905_v61 = vmul.f32 0.2, %v1893_v60  ;;  %v1910_v1 = vsel %vm1898_vm13, %v1892_v44, %v1904_v57 }
 0x1ee   : > { %v1911_v3 = vsel %vm1899_vm0, %v1893_v60, %v1905_v61 }
 0x1ef   : > { %v5073_v7 = vpack.c.bf16 %v1911_v3, %v1910_v1 }
 0x1f1   : > { %3963 = vmatmul.mubr.msk.bf16.gmra.mrb[92].mxu1 %vm841_vm15, %v5073_v7 }
 0x2b4   : > { %v1989_v8 = vpop.f32.mrb[84].mxu1 }
 0x2b5   : > { %v1990_v10 = vadd.f32 %v3503_v9, %v1989_v8  ;;  %v3956_v12 = vpop.f32.mrb[85].mxu1 }
 0x2b6   : > { %v1992_v13 = vpop.f32.mrb[86].mxu1  ;;  %v2137_v12 = vld [vmem:[#allocation3 + $0x10] sm:$0xf] }
 0x2b7   : > { %v2018_v15 = vmul.f32 0.2, %v1990_v10  ;;  %v1993_v43 = vadd.f32 %v3503_v9, %v1992_v13  ;;  %v3957_v16 = vpop.f32.mrb[87].mxu1  ;;  %vm2012_vm14 = vcmp.ge.f32.partialorder %v1990_v10, 0.0 }
 0x2b9   : > { %v2019_v17 = vmul.f32 0.2, %v1993_v43  ;;  %vm2013_vm1 = vcmp.ge.f32.partialorder %v1993_v43, 0.0  ;;  %v2024_v19 = vsel %vm2012_vm14, %v1990_v10, %v2018_v15 }
 0x2bb   : > { %v2025_v21 = vsel %vm2013_vm1, %v1993_v43, %v2019_v17  ;;  %v2140_v17 = vld [vmem:[#allocation3 + $0x14] sm:$0x1] }
 0x2bc   : > { %v1997_v18 = vpop.f32.mrb[88].mxu1  ;;  %v2030_v23 = vpack.c.bf16 %v2025_v21, %v2024_v19  ;;  %v2143_v19 = vld [vmem:[#allocation3 + $0x18] sm:$0xf]  ;;  %v2146_v21 = vld [vmem:[#allocation3 + $0x1c] sm:$0x1] }
 0x2bd   : > { %v1998_v24 = vadd.f32 %v3503_v9, %v1997_v18  ;;  %v3960_v22 = vpop.f32.mrb[89].mxu1 }
 0x2be   : > { %2036 = vrot.lane.b32.xlu0 %v2030_v23, %s4360_s14  ;;  %v2000_v26 = vpop.f32.mrb[90].mxu1 }
 0x2bf   : > { %v2020_v31 = vmul.f32 0.2, %v1998_v24  ;;  %v2001_v32 = vadd.f32 %v3503_v9, %v2000_v26  ;;  %v3961_v35 = vpop.f32.mrb[91].mxu1  ;;  %vm2014_vm4 = vcmp.ge.f32.partialorder %v1998_v24, 0.0 }
 0x2c1   : > { %vm2015_vm7 = vcmp.ge.f32.partialorder %v2001_v32, 0.0  ;;  %v2021_v33 = vmul.f32 0.2, %v2001_v32  ;;  %v2026_v37 = vsel %vm2014_vm4, %v1998_v24, %v2020_v31 }
 0x2c3   : > { %v2027_v20 = vsel %vm2015_vm7, %v2001_v32, %v2021_v33 }
 0x2c4   : > { %v2005_v36 = vpop.f32.mrb[92].mxu1  ;;  %v2031_v62 = vpack.c.bf16 %v2027_v20, %v2026_v37 }
 0x2c5   : > { %v2006_v63 = vadd.f32 %v3503_v9, %v2005_v36  ;;  %v3964_v42 = vpop.f32.mrb[93].mxu1 }
 0x2c6   : > { %2038 = vrot.lane.b32.xlu0 %v2031_v62, %s4360_s14  ;;  %v2008_v27 = vpop.f32.mrb[94].mxu1 }
 0x2c7   : > { %v2022_v38 = vmul.f32 0.2, %v2006_v63  ;;  %v2009_v46 = vadd.f32 %v3503_v9, %v2008_v27  ;;  %v3965_v40 = vpop.f32.mrb[95].mxu1  ;;  %vm2016_vm9 = vcmp.ge.f32.partialorder %v2006_v63, 0.0 }
 0x2c8   : > { %v2152_v40 = vld [vmem:[#allocation3 + $0x24] sm:$0x1] }
 0x2c9   : > { %v2023_v41 = vmul.f32 0.2, %v2009_v46  ;;  %vm2017_vm10 = vcmp.ge.f32.partialorder %v2009_v46, 0.0  ;;  %v2028_v0 = vsel %vm2016_vm9, %v2006_v63, %v2022_v38  ;;  %v2149_v63 = vld [vmem:[#allocation3 + $0x20] sm:$0xf] }
 0x2cb   : > { %v2029_v45 = vsel %vm2017_vm10, %v2009_v46, %v2023_v41  ;;  %v2155_v41 = vld [vmem:[#allocation3 + $0x28] sm:$0xf] }
 0x2cc   : > { %v2032_v49 = vpack.c.bf16 %v2029_v45, %v2028_v0  ;;  %v2158_v0 = vld [vmem:[#allocation3 + $0x2c] sm:$0x1] }
 0x2ce   : > { %2040 = vrot.lane.b32.xlu1 %v2032_v49, %s4360_s14 }
 0x330   : > { %v2037_v51 = vpop.permute.xlu0 %2036 }
 0x331   : > { %v2043_v53 = vsel %vm841_vm15, %v5058_v56, %v2037_v51 }
 0x332   : > { %v3510_v30 = vcombine.low %v2043_v53, %v2043_v53  ;;  %v3511_v58 = vcombine.high %v2043_v53, %v2043_v53 }
 0x334   : > { %v2064_v34 = vshrl.u32 %v3510_v30, 16  ;;  %v2072_v55 = vshrl.u32 %v3511_v58, 16  ;;  %v2067_v25 = vshll.u32 %v3510_v30, 16  ;;  %v2075_v5 = vshll.u32 %v3511_v58, 16 }
 0x336   : > { %v2066_v4 = vrot.slane %v2064_v34, 7  ;;  %v2074_v50 = vrot.slane %v2072_v55, 7 }
 0x338   : > { %v2069_v56 = vor.u32 %v2067_v25, %v2066_v4  ;;  %v2070_v39 = vrot.slane %v2066_v4, 4  ;;  %v2077_v28 = vor.u32 %v2075_v5, %v2074_v50  ;;  %v2078_v44 = vrot.slane %v2074_v50, 4  ;;  %v2039_v48 = vpop.permute.xlu0 %2038 }
 0x339   : > { %v2045_v57 = vsel %vm841_vm15, %v5066_v47, %v2039_v48 }
 0x33a   : > { %v2126_v60 = vsel %vm5084_vm12, %v2069_v56, %v2125_v59  ;;  %v2129_v61 = vsel %vm4551_vm6, %v2070_v39, %v2128_v54  ;;  %v2132_v1 = vsel %vm5084_vm12, %v2077_v28, %v2131_v6  ;;  %v2135_v3 = vsel %vm4551_vm6, %v2078_v44, %v2134_v14 }
 0x33b   : > { %2127 = vst [vmem:[#allocation3] sm:$0xf] %v2126_v60  ;;  %2130 = vst [vmem:[#allocation3 + $0x4] sm:$0x1] %v2129_v61  ;;  %v3512_v9 = vcombine.low %v2045_v57, %v2045_v57  ;;  %v3513_v8 = vcombine.high %v2045_v57, %v2045_v57  ;;  %v4361_v59 = vmov (!%p3357_p5), 0  }
 0x33c   : > { %2133 = vst [vmem:[#allocation3 + $0x8] sm:$0xf] %v2132_v1  ;;  %2136 = vst [vmem:[#allocation3 + $0xc] sm:$0x1] %v2135_v3 }
 0x33d   : > { %v2080_v10 = vshrl.u32 %v3512_v9, 16  ;;  %v2088_v47 = vshrl.u32 %v3513_v8, 16  ;;  %v2083_v15 = vshll.u32 %v3512_v9, 16  ;;  %v2091_v16 = vshll.u32 %v3513_v8, 16  ;;  %2165 = vst.msk [vmem:[#allocation3] sm:$0xf] (!%p3357_p5), %vm2123_vm11, %v4361_v59 }
 0x33e   : > { %2167 = vst.msk [vmem:[#allocation3 + $0x4] sm:$0x1] (!%p3357_p5), %vm530_vm5, %v4361_v59 }
 0x33f   : > { %v2082_v13 = vrot.slane %v2080_v10, 7  ;;  %v2090_v43 = vrot.slane %v2088_v47, 7 }
 0x340   : > { %v2041_v18 = vpop.permute.xlu1 %2040 }
 0x341   : > { %v2085_v23 = vor.u32 %v2083_v15, %v2082_v13  ;;  %v2086_v24 = vrot.slane %v2082_v13, 4  ;;  %v2093_v22 = vor.u32 %v2091_v16, %v2090_v43  ;;  %v2094_v26 = vrot.slane %v2090_v43, 4 }
 0x342   : > { %v2047_v31 = vsel %vm841_vm15, %v5073_v7, %v2041_v18 }
 0x343   : > { %v2138_v32 = vsel %vm5084_vm12, %v2085_v23, %v2137_v12  ;;  %v2141_v35 = vsel %vm4551_vm6, %v2086_v24, %v2140_v17  ;;  %v2144_v33 = vsel %vm5084_vm12, %v2093_v22, %v2143_v19  ;;  %v2147_v37 = vsel %vm4551_vm6, %v2094_v26, %v2146_v21 }
 0x344   : > { %2139 = vst [vmem:[#allocation3 + $0x10] sm:$0xf] %v2138_v32  ;;  %2142 = vst [vmem:[#allocation3 + $0x14] sm:$0x1] %v2141_v35  ;;  %v3514_v20 = vcombine.low %v2047_v31, %v2047_v31  ;;  %v3515_v36 = vcombine.high %v2047_v31, %v2047_v31 }
 0x345   : > { %2145 = vst [vmem:[#allocation3 + $0x18] sm:$0xf] %v2144_v33  ;;  %2148 = vst [vmem:[#allocation3 + $0x1c] sm:$0x1] %v2147_v37 }
 0x346   : > { %v2096_v62 = vshrl.u32 %v3514_v20, 16  ;;  %v2104_v7 = vshrl.u32 %v3515_v36, 16  ;;  %v2099_v27 = vshll.u32 %v3514_v20, 16  ;;  %v2107_v46 = vshll.u32 %v3515_v36, 16 }
 0x348   : > { %v2098_v42 = vrot.slane %v2096_v62, 7  ;;  %v2106_v38 = vrot.slane %v2104_v7, 7  ;;  %2163 = sbr.rel (%p3357_p5) target bundleno = 847 (0x34f), region = 76 }
 0x34a   : > { %v2101_v45 = vor.u32 %v2099_v27, %v2098_v42  ;;  %v2102_v49 = vrot.slane %v2098_v42, 4  ;;  %v2109_v51 = vor.u32 %v2107_v46, %v2106_v38  ;;  %v2110_v53 = vrot.slane %v2106_v38, 4 }
 0x34c   : > { %v2150_v30 = vsel %vm5084_vm12, %v2101_v45, %v2149_v63  ;;  %v2153_v58 = vsel %vm4551_vm6, %v2102_v49, %v2152_v40  ;;  %v2156_v34 = vsel %vm5084_vm12, %v2109_v51, %v2155_v41  ;;  %v2159_v55 = vsel %vm4551_vm6, %v2110_v53, %v2158_v0 }
 0x34d   : > { %2151 = vst [vmem:[#allocation3 + $0x20] sm:$0xf] %v2150_v30  ;;  %2154 = vst [vmem:[#allocation3 + $0x24] sm:$0x1] %v2153_v58 }
 0x34e   : > { %2157 = vst [vmem:[#allocation3 + $0x28] sm:$0xf] %v2156_v34  ;;  %2160 = vst [vmem:[#allocation3 + $0x2c] sm:$0x1] %v2159_v55 }
 0x34f PF: > { %2170 = sbr.rel (%p3367_p7) target bundleno = 854 (0x356), region = 80  ;;  %v4362_v54 = vmov (!%p3367_p7), 0  }
 0x350   : > { %2173 = vst.msk [vmem:[#allocation3 + $0x28] sm:$0xf] (!%p3367_p7), %vm2123_vm11, %v4362_v54 }
 0x351   : > { %2175 = vst.msk [vmem:[#allocation3 + $0x2c] sm:$0x1] (!%p3367_p7), %vm530_vm5, %v4362_v54 }
 0x356 PF: > { %v4221_v29 = vld [vmem:[%s5388_s7 + $0x60] sm:$0xff]   ;;  %v4222_v4 = vld [vmem:[%s5388_s7 + $0x68] sm:$0xff]   ;;  %v4223_v25 = vld [vmem:[%s5388_s7 + $0x70] sm:$0xff]   ;;  %vm2233_vm3 = vcmask 523264   ;;  %s3660_s29 = sshll.u32 %s4344_s13, 3  ;;  %s3221_s14 = sshll.u32 %s4612_s18, 4  ;;  %s5319_s14 = int_to_ptr.vmem [resolvable:$true] %s3221_s14 }
 0x357   : > { %3966 = vmatprep.subr.bf16.mxu0 %v4221_v29  ;;  %v2177_v50 = vld [vmem:[#allocation3 + $0x8] sm:$0xf]  ;;  %v2178_v5 = vld [vmem:[#allocation3 + $0x10] sm:$0xf]  ;;  %v4224_v6 = vld [vmem:[%s5388_s7 + $0x78] sm:$0xff]   ;;  %s3218_s19 = sadd.s32 %s3660_s29, %s4512_s24  ;;  %s4262_s26 = scalar_lea.vmem %s5319_s14, 512 }
 0x358   : > { %3967 = vmatpush3.bf16.msra.mxu0 %v4221_v29  ;;  %v3526_v11 = vcombine.low %v2177_v50, %v2178_v5  ;;  %v2176_v14 = vld [vmem:[#allocation3] sm:$0xf]  ;;  %v2179_v56 = vld [vmem:[#allocation3 + $0x18] sm:$0xf]  ;;  %v4231_v57 = vld [vmem:[%s5388_s7 + $0x8] sm:$0xff]   ;;  %s3661_s13 = sshll.u32 %s3218_s19, 7  ;;  %p4263_p10 = scmp.ne.s32.totalorder %s5319_s14, %s4262_s26 }
 0x359   : > { %3968 = vmatprep.subr.bf16.mxu0 %v4222_v4  ;;  %v5137_v39 = vld [vmem:[#allocation3 + $0x20] sm:$0xf]  ;;  %v3534_v48 = vcombine.low %v2176_v14, %v2177_v50  ;;  %v4232_v60 = vld [vmem:[%s5388_s7 + $0x10] sm:$0xff]   ;;  %v4233_v1 = vld [vmem:[%s5388_s7 + $0x18] sm:$0xff]   ;;  %v3535_v13 = vcombine.low %v2178_v5, %v2179_v56  ;;  %s5317_s20 = scalar_lea.hbm %s5390_s9, %s3661_s13  ;;  %s4363_s21 = smov [#allocation4]  }
 0x35a   : > { %3974 = vmatprep.mubr.msk.bf16.mxu0 %vm2233_vm3, %v3526_v11  ;;  %v4230_v28 = vld [vmem:[%s5388_s7] sm:$0xff]   ;;  %v3527_v44 = vcombine.low %v2179_v56, %v5137_v39  ;;  %v2466_v3 = vld [vmem:[#allocation3 + $0x8] sm:$0xf]  ;;  %v5162_v16 = vld [vmem:[#allocation3 + $0xc] sm:$0x1]  ;;  %p4264_p11 = pnand %p4263_p10, %p4467_p3  ;;  %s4266_s12 = sshll.u32 %s4363_s21, 4  ;;  %s4267_s12 = int_to_ptr.vmem [resolvable:$false] %s4266_s12 }
 0x35b   : > { %v2464_v61 = vld [vmem:[#allocation3] sm:$0xf]  ;;  %v2491_v47 = vshrl.u32 %v2466_v3, 16  ;;  %v2494_v12 = vshll.u32 %v2466_v3, 16  ;;  %v4235_v15 = vld [vmem:[%s5388_s7 + $0xc8] sm:$0xff]   ;;  %v2500_v24 = vshll.u32 %v5162_v16, 16  ;;  %p4269_p13 = scmp.lt.s32.totalorder %s5319_s14, %s4267_s12 }
 0x35c   : > { %3969 = vmatpush3.bf16.msra.mxu0 %v4222_v4  ;;  %v4234_v9 = vld [vmem:[%s5388_s7 + $0xc0] sm:$0xff]   ;;  %v2477_v8 = vshrl.u32 %v2464_v61, 16  ;;  %v2480_v10 = vshll.u32 %v2464_v61, 16  ;;  %v4236_v22 = vld [vmem:[%s5388_s7 + $0xd0] sm:$0xff]   ;;  %v4237_v32 = vld [vmem:[%s5388_s7 + $0xd8] sm:$0xff]   ;;  %p4265_p12 = pneg %p4264_p11  ;;  %s4268_s17 = scalar_lea.vmem %s4267_s12, 1024 }
 0x35d   : > { %3970 = vmatprep.subr.bf16.mxu0 %v4223_v25  ;;  %v5160_v43 = vld [vmem:[#allocation3 + $0x4] sm:$0x1]  ;;  %v2493_v21 = vrot.slane %v2491_v47, 4  ;;  %v2496_v18 = vrot.slane %v2494_v12, 5  ;;  %v2502_v33 = vrot.slane %v2500_v24, 5  ;;  %v4239_v45 = vld [vmem:[%s5388_s7 + $0x28] sm:$0xff]   ;;  %p4270_p0 = scmp.lt.s32.totalorder %s4268_s17, %s4262_s26 }
 0x35e   : > { %v2479_v17 = vrot.slane %v2477_v8, 4  ;;  %v2482_v19 = vrot.slane %v2480_v10, 5  ;;  %v2486_v23 = vshll.u32 %v5160_v43, 16  ;;  %v2468_v37 = vld [vmem:[#allocation3 + $0x10] sm:$0xf]  ;;  %v4238_v46 = vld [vmem:[%s5388_s7 + $0x20] sm:$0xff]  }
 0x35f   : > { %v2497_v31 = vor.u32 %v2496_v18, %v2493_v21  ;;  %v2470_v20 = vld [vmem:[#allocation3 + $0x18] sm:$0xf]  ;;  %v2181_v7 = vld [vmem:[#allocation3 + $0x28] sm:$0xf]  ;;  %v2505_v63 = vshrl.u32 %v2468_v37, 16  ;;  %v2508_v42 = vshll.u32 %v2468_v37, 16  ;;  %p4271_p1 = por %p4270_p0, %p4269_p13 }
 0x360   : > { %3971 = vmatpush3.bf16.msra.mxu0 %v4223_v25  ;;  %v2483_v26 = vor.u32 %v2482_v19, %v2479_v17  ;;  %v2488_v35 = vrot.slane %v2486_v23, 5  ;;  %v2519_v27 = vshrl.u32 %v2470_v20, 16  ;;  %v2522_v38 = vshll.u32 %v2470_v20, 16  ;;  %v5185_v49 = vld [vmem:[#allocation3 + $0x14] sm:$0x1]  ;;  %v4241_v14 = vld [vmem:[%s5388_s7 + $0x38] sm:$0xff]  }
 0x361   : > { %3972 = vmatprep.subr.bf16.mxu0 %v4224_v6  ;;  %v2498_v62 = vrot.slane %v2497_v31, 4  ;;  %v3550_v0 = vcombine.low %v5137_v39, %v2181_v7  ;;  %v2507_v51 = vrot.slane %v2505_v63, 4  ;;  %v2510_v53 = vrot.slane %v2508_v42, 5  ;;  %v5187_v55 = vld [vmem:[#allocation3 + $0x1c] sm:$0x1]  ;;  %v4240_v25 = vld [vmem:[%s5388_s7 + $0x30] sm:$0xff]   ;;  %p4272_p2 = pnand %p4271_p1, %p4265_p12 }
 0x362   : > { %v2484_v36 = vrot.slane %v2483_v26, 4  ;;  %v2521_v58 = vrot.slane %v2519_v27, 4  ;;  %v2524_v34 = vrot.slane %v2522_v38, 5  ;;  %v2514_v54 = vshll.u32 %v5185_v49, 16  ;;  %v2472_v56 = vld [vmem:[#allocation3 + $0x20] sm:$0xf] }
 0x363   : > { %v2503_v41 = vsel %vm4832_vm8, %v2498_v62, %v2502_v33  ;;  %v2511_v59 = vor.u32 %v2510_v53, %v2507_v51  ;;  %v2528_v4 = vshll.u32 %v5187_v55, 16  ;;  %v5209_v8 = vld [vmem:[#allocation3 + $0x24] sm:$0x1]  ;;  %v4244_v12 = vld [vmem:[%s5388_s7 + $0x90] sm:$0xff]   ;;  %v4245_v17 = vld [vmem:[%s5388_s7 + $0x98] sm:$0xff]   ;;  %v2864_v38 = vrot.slane %v5160_v43, 5 }
 0x364   : > { %3973 = vmatpush3.bf16.msra.mxu0 %v4224_v6  ;;  %v2489_v40 = vsel %vm4832_vm8, %v2484_v36, %v2488_v35  ;;  %v2525_v29 = vor.u32 %v2524_v34, %v2521_v58  ;;  %v2516_v5 = vrot.slane %v2514_v54, 5  ;;  %v2542_v47 = vshll.u32 %v5209_v8, 16  ;;  %v2474_v19 = vld [vmem:[#allocation3 + $0x28] sm:$0xf]  ;;  %v4246_v24 = vld [vmem:[%s5388_s7 + $0xe0] sm:$0xff]   ;;  %v4248_v20 = vld [vmem:[%s5388_s7 + $0xf0] sm:$0xff]  }
 0x365   : > { %3978 = vmatprep.subr.bf16.mxu0 %v4230_v28  ;;  %v3565_v30 = vcombine.low %v2489_v40, %v2503_v41  ;;  %v2512_v50 = vrot.slane %v2511_v59, 4  ;;  %v2530_v6 = vrot.slane %v2528_v4, 5  ;;  %v2547_v18 = vshrl.u32 %v2474_v19, 16  ;;  %v5228_v35 = vld [vmem:[#allocation3 + $0x2c] sm:$0x1]  ;;  %v4249_v42 = vld [vmem:[%s5388_s7 + $0xf8] sm:$0xff]  }
 0x366   : > { %v2526_v11 = vrot.slane %v2525_v29, 4  ;;  %v2550_v23 = vshll.u32 %v2474_v19, 16  ;;  %v2556_v37 = vshll.u32 %v5228_v35, 16  ;;  %v2844_v36 = vld [vmem:[#allocation3] sm:$0xe]  ;;  %v2868_v40 = vrot.slane %v5162_v16, 5 }
 0x367   : > { %3975 = vmatmul.mubr.msk.bf16.vlgmr.msra.gmra.mrb[24].mxu0 %vm2233_vm3, %v3527_v44  ;;  %v2517_v39 = vsel %vm4832_vm8, %v2512_v50, %v2516_v5  ;;  %v2533_v44 = vshrl.u32 %v2472_v56, 16  ;;  %v2549_v26 = vrot.slane %v2547_v18, 4  ;;  %v2845_v62 = vld [vmem:[#allocation3 + $0x8] sm:$0xe]  ;;  %v3604_v27 = vrot.slane %v2844_v36, 9  ;;  %v4252_v16 = vld [vmem:[%s5388_s7 + $0x50] sm:$0xff]  }
 0x368   : > { %3979 = vmatpush3.bf16.msra.mxu0 %v4230_v28  ;;  %3986 = vmatprep.mubr.msk.bf16.mxu0 %vm2233_vm3, %v3534_v48  ;;  %v2531_v28 = vsel %vm4832_vm8, %v2526_v11, %v2530_v6  ;;  %v2536_v48 = vshll.u32 %v2472_v56, 16  ;;  %v3581_v61 = vcombine.low %v2503_v41, %v2517_v39  ;;  %v2552_v31 = vrot.slane %v2550_v23, 5  ;;  %v4251_v52 = vld [vmem:[%s5388_s7 + $0x48] sm:$0xff]   ;;  %v2847_v58 = vld [vmem:[#allocation3 + $0x18] sm:$0xe]  ;;  %v4256_v6 = vld [vmem:[%s5388_s7 + $0xb0] sm:$0xff]  }
 0x369   : > { %3980 = vmatprep.subr.bf16.mxu0 %v4231_v57  ;;  %v2558_v63 = vrot.slane %v2556_v37, 5  ;;  %v2872_v59 = vrot.slane %v5185_v49, 5  ;;  %v3607_v54 = vrot.slane %v2847_v58, 9  ;;  %v2876_v29 = vrot.slane %v5187_v55, 5  ;;  %v4253_v4 = vld [vmem:[%s5388_s7 + $0x58] sm:$0xff]   ;;  %v4254_v49 = vld [vmem:[%s5388_s7 + $0xa0] sm:$0xff]  }
 0x36a   : > { %v2538_v3 = vrot.slane %v2536_v48, 5  ;;  %v2553_v33 = vor.u32 %v2552_v31, %v2549_v26  ;;  %v4255_v11 = vld [vmem:[%s5388_s7 + $0xa8] sm:$0xff]   ;;  %v4258_v48 = vld [vmem:[%s5388_s7 + $0x100] sm:$0xff]   ;;  %v3195_v18 = vld [vmem:[%s4565_s27 + $0x10] sm:$0xff] }
 0x36b   : > { %v2877_v50 = vsel %vm4753_vm2, %v3607_v54, %v2876_v29  ;;  %v3193_v26 = vld [vmem:[%s4565_s27] sm:$0xff] }
 0x36c   : > { %3981 = vmatpush3.bf16.msra.mxu0 %v4231_v57  ;;  %v4242_v57 = vld [vmem:[%s5388_s7 + $0x80] sm:$0xff]   ;;  %v2554_v7 = vrot.slane %v2553_v33, 4  ;;  %v3196_v33 = vld [vmem:[%s4565_s27 + $0x18] sm:$0xff] }
 0x36d   : > { %3982 = vmatprep.subr.bf16.mxu0 %v4232_v60 }
 0x36e   : > { %v2559_v41 = vsel %vm4832_vm8, %v2554_v7, %v2558_v63 }
 0x370   : > { %3983 = vmatpush3.bf16.msra.mxu0 %v4232_v60  ;;  %v3566_v60 = vcombine.low %v2517_v39, %v2531_v28  ;;  %v2880_v39 = vrot.slane %v5209_v8, 5  ;;  %v4261_v8 = vld [vmem:[%s5388_s7 + $0x118] sm:$0xff]  }
 0x371   : > { %3984 = vmatprep.subr.bf16.mxu0 %v4233_v1 }
 0x374   : > { %3985 = vmatpush3.bf16.msra.mxu0 %v4233_v1  ;;  %v2535_v1 = vrot.slane %v2533_v44, 4 }
 0x375   : > { %3990 = vmatprep.subr.bf16.mxu0 %v4234_v9 }
 0x376   : > { %v2539_v10 = vor.u32 %v2538_v3, %v2535_v1  ;;  %v2849_v1 = vld [vmem:[#allocation3 + $0x28] sm:$0xe] }
 0x377   : > { %3987 = vmatmul.mubr.msk.bf16.vlgmr.msra.gmra.mrb[24].mxu0 %vm2233_vm3, %v3535_v13  ;;  %v3609_v3 = vrot.slane %v2849_v1, 9 }
 0x378   : > { %3991 = vmatpush3.bf16.msra.mxu0 %v4234_v9  ;;  %3998 = vmatprep.mubr.msk.bf16.mxu0 %vm2233_vm3, %v3535_v13  ;;  %v4243_v9 = vld [vmem:[%s5388_s7 + $0x88] sm:$0xff]   ;;  %v2540_v13 = vrot.slane %v2539_v10, 4 }
 0x379   : > { %3992 = vmatprep.subr.bf16.mxu0 %v4235_v15 }
 0x37c   : > { %3993 = vmatpush3.bf16.msra.mxu0 %v4235_v15  ;;  %v2544_v15 = vrot.slane %v2542_v47, 5 }
 0x37d   : > { %3994 = vmatprep.subr.bf16.mxu0 %v4236_v22 }
 0x37e   : > { %v2545_v21 = vsel %vm4832_vm8, %v2540_v13, %v2544_v15 }
 0x37f   : > { %v3597_v53 = vcombine.low %v2545_v21, %v2559_v41 }
 0x380   : > { %3995 = vmatpush3.bf16.msra.mxu0 %v4236_v22  ;;  %v3582_v22 = vcombine.low %v2531_v28, %v2545_v21  ;;  %v4257_v28 = vld [vmem:[%s5388_s7 + $0xb8] sm:$0xff]  }
 0x381   : > { %3996 = vmatprep.subr.bf16.mxu0 %v4237_v32 }
 0x384   : > { %3997 = vmatpush3.bf16.msra.mxu0 %v4237_v32  ;;  %v4247_v32 = vld [vmem:[%s5388_s7 + $0xe8] sm:$0xff]  }
 0x385   : > { %4002 = vmatprep.subr.bf16.mxu0 %v4238_v46 }
 0x387   : > { %3999 = vmatmul.mubr.msk.bf16.vlgmr.msra.gmra.mrb[24].mxu0 %vm2233_vm3, %v3550_v0  ;;  %v4250_v0 = vld [vmem:[%s5388_s7 + $0x40] sm:$0xff]  }
 0x388   : > { %4003 = vmatpush3.bf16.msra.mxu0 %v4238_v46  ;;  %4010 = vmatprep.mubr.msk.bf16.mxu0 %vm2233_vm3, %v3565_v30  ;;  %v3605_v46 = vrot.slane %v2845_v62, 9  ;;  %v2846_v30 = vld [vmem:[#allocation3 + $0x10] sm:$0xe]  ;;  %v3194_v62 = vld [vmem:[%s4565_s27 + $0x8] sm:$0xff]  ;;  %s5424_s27 = sand.u32 1, %s4332_s10  }
 0x389   : > { %4004 = vmatprep.subr.bf16.mxu0 %v4239_v45  ;;  %v3606_v34 = vrot.slane %v2846_v30, 9  ;;  %s5329_s28 = scalar_lea.sflag [#allocation5], %s5424_s27 }
 0x38a   : > { %v2869_v51 = vsel %vm4753_vm2, %v3605_v46, %v2868_v40 }
 0x38c   : > { %4005 = vmatpush3.bf16.msra.mxu0 %v4239_v45  ;;  %v2865_v45 = vsel %vm4753_vm2, %v3604_v27, %v2864_v38 }
 0x38d   : > { %4006 = vmatprep.subr.bf16.mxu0 %v4240_v25  ;;  %v3618_v43 = vcombine.low %v2865_v45, %v2869_v51 }
 0x390   : > { %4007 = vmatpush3.bf16.msra.mxu0 %v4240_v25  ;;  %v2873_v25 = vsel %vm4753_vm2, %v3606_v34, %v2872_v59 }
 0x391   : > { %4008 = vmatprep.subr.bf16.mxu0 %v4241_v14  ;;  %v3619_v5 = vcombine.low %v2873_v25, %v2877_v50  ;;  %v3634_v55 = vcombine.low %v2869_v51, %v2873_v25 }
 0x394   : > { %4009 = vmatpush3.bf16.msra.mxu0 %v4241_v14  ;;  %v2848_v14 = vld [vmem:[#allocation3 + $0x20] sm:$0xe] }
 0x395   : > { %4014 = vmatprep.subr.bf16.mxu0 %v4242_v57  ;;  %v3608_v56 = vrot.slane %v2848_v14, 9 }
 0x397   : > { %4011 = vmatmul.mubr.msk.bf16.vlgmr.msra.gmra.mrb[24].mxu0 %vm2233_vm3, %v3566_v60  ;;  %v2881_v44 = vsel %vm4753_vm2, %v3608_v56, %v2880_v39 }
 0x398   : > { %4015 = vmatpush3.bf16.msra.mxu0 %v4242_v57  ;;  %4022 = vmatprep.mubr.msk.bf16.mxu0 %vm2233_vm3, %v3581_v61  ;;  %v3635_v57 = vcombine.low %v2877_v50, %v2881_v44  ;;  %v4260_v61 = vld [vmem:[%s5388_s7 + $0x110] sm:$0xff]  }
 0x399   : > { %4016 = vmatprep.subr.bf16.mxu0 %v4243_v9 }
 0x39c   : > { %4017 = vmatpush3.bf16.msra.mxu0 %v4243_v9  ;;  %v2884_v9 = vrot.slane %v5228_v35, 5 }
 0x39d   : > { %4018 = vmatprep.subr.bf16.mxu0 %v4244_v12 }
 0x39e   : > { %v2885_v10 = vsel %vm4753_vm2, %v3609_v3, %v2884_v9 }
 0x39f   : > { %v3650_v47 = vcombine.low %v2881_v44, %v2885_v10 }
 0x3a0   : > { %4019 = vmatpush3.bf16.msra.mxu0 %v4244_v12  ;;  %v3657_v12 = vld [vmem:[%s5389_s8] ss:$0 sm:$0xff] }
 0x3a1   : > { %4020 = vmatprep.subr.bf16.mxu0 %v4245_v17 }
 0x3a4   : > { %4021 = vmatpush3.bf16.msra.mxu0 %v4245_v17 }
 0x3a5   : > { %4026 = vmatprep.subr.bf16.mxu0 %v4246_v24 }
 0x3a7   : > { %4023 = vmatmul.mubr.msk.bf16.vlgmr.msra.gmra.mrb[24].mxu0 %vm2233_vm3, %v3582_v22 }
 0x3a8   : > { %4027 = vmatpush3.bf16.msra.mxu0 %v4246_v24  ;;  %4034 = vmatprep.mubr.msk.bf16.mxu0 %vm2233_vm3, %v3566_v60  ;;  %v4259_v60 = vld [vmem:[%s5388_s7 + $0x108] sm:$0xff]  }
 0x3a9   : > { %4028 = vmatprep.subr.bf16.mxu0 %v4247_v32 }
 0x3ac   : > { %4029 = vmatpush3.bf16.msra.mxu0 %v4247_v32 }
 0x3ad   : > { %4030 = vmatprep.subr.bf16.mxu0 %v4248_v20 }
 0x3b0   : > { %4031 = vmatpush3.bf16.msra.mxu0 %v4248_v20 }
 0x3b1   : > { %4032 = vmatprep.subr.bf16.mxu0 %v4249_v42 }
 0x3b4   : > { %4033 = vmatpush3.bf16.msra.mxu0 %v4249_v42 }
 0x3b5   : > { %4038 = vmatprep.subr.bf16.mxu0 %v4250_v0 }
 0x3b7   : > { %4035 = vmatmul.mubr.msk.bf16.vlgmr.msra.gmra.mrb[24].mxu0 %vm2233_vm3, %v3597_v53 }
 0x3b8   : > { %4039 = vmatpush3.bf16.msra.mxu0 %v4250_v0  ;;  %4046 = vmatprep.mubr.msk.bf16.mxu0 %vm2233_vm3, %v3618_v43 }
 0x3b9   : > { %4040 = vmatprep.subr.bf16.mxu0 %v4251_v52 }
 0x3bc   : > { %4041 = vmatpush3.bf16.msra.mxu0 %v4251_v52 }
 0x3bd   : > { %4042 = vmatprep.subr.bf16.mxu0 %v4252_v16 }
 0x3c0   : > { %4043 = vmatpush3.bf16.msra.mxu0 %v4252_v16 }
 0x3c1   : > { %4044 = vmatprep.subr.bf16.mxu0 %v4253_v4 }
 0x3c4   : > { %4045 = vmatpush3.bf16.msra.mxu0 %v4253_v4 }
 0x3c5   : > { %4050 = vmatprep.subr.bf16.mxu0 %v4254_v49 }
 0x3c7   : > { %4047 = vmatmul.mubr.msk.bf16.vlgmr.msra.gmra.mrb[24].mxu0 %vm2233_vm3, %v3619_v5 }
 0x3c8   : > { %4051 = vmatpush3.bf16.msra.mxu0 %v4254_v49  ;;  %4058 = vmatprep.mubr.msk.bf16.mxu0 %vm2233_vm3, %v3634_v55 }
 0x3c9   : > { %4052 = vmatprep.subr.bf16.mxu0 %v4255_v11 }
 0x3cc   : > { %4053 = vmatpush3.bf16.msra.mxu0 %v4255_v11 }
 0x3cd   : > { %4054 = vmatprep.subr.bf16.mxu0 %v4256_v6 }
 0x3d0   : > { %4055 = vmatpush3.bf16.msra.mxu0 %v4256_v6 }
 0x3d1   : > { %4056 = vmatprep.subr.bf16.mxu0 %v4257_v28 }
 0x3d4   : > { %4057 = vmatpush3.bf16.msra.mxu0 %v4257_v28 }
 0x3d5   : > { %4062 = vmatprep.subr.bf16.mxu0 %v4258_v48 }
 0x3d7   : > { %4059 = vmatmul.mubr.msk.bf16.vlgmr.msra.gmra.mrb[24].mxu0 %vm2233_vm3, %v3635_v57 }
 0x3d8   : > { %4063 = vmatpush3.bf16.msra.mxu0 %v4258_v48  ;;  %4070 = vmatprep.mubr.msk.bf16.mxu0 %vm2233_vm3, %v3619_v5 }
 0x3d9   : > { %4064 = vmatprep.subr.bf16.mxu0 %v4259_v60 }
 0x3dc   : > { %4065 = vmatpush3.bf16.msra.mxu0 %v4259_v60 }
 0x3dd   : > { %4066 = vmatprep.subr.bf16.mxu0 %v4260_v61 }
 0x3e0   : > { %4067 = vmatpush3.bf16.msra.mxu0 %v4260_v61 }
 0x3e1   : > { %4068 = vmatprep.subr.bf16.mxu0 %v4261_v8 }
 0x3e4   : > { %4069 = vmatpush3.bf16.msra.mxu0 %v4261_v8 }
 0x3e7   : > { %4071 = vmatmul.mubr.msk.bf16.vlgmr.msra.gmra.mrb[24].mxu0 %vm2233_vm3, %v3650_v47 }
 0x4ba   : > { %v4072_v13 = vpop.f32.mrb[24].mxu0 }
 0x4bb   : > { %v3179_v15 = vadd.f32 %v4072_v13, %v3657_v12  ;;  %v3151_v17 = vpop.f32.mrb[25].mxu0 }
 0x4bc   : > { %v3177_v19 = vadd.f32 %v3657_v12, %v3151_v17  ;;  %v4073_v21 = vpop.f32.mrb[26].mxu0 }
 0x4bd   : > { %vm3183_vm5 = vcmp.ge.f32.partialorder %v3179_v15, 0.0  ;;  %v3187_v2 = vmul.f32 0.2, %v3179_v15  ;;  %v3180_v23 = vadd.f32 %v4073_v21, %v3657_v12  ;;  %v3154_v24 = vpop.f32.mrb[27].mxu0 }
 0x4be   : > { %vm3181_vm6 = vcmp.ge.f32.partialorder %v3177_v19, 0.0  ;;  %v3185_v22 = vmul.f32 0.2, %v3177_v19  ;;  %v3178_v31 = vadd.f32 %v3657_v12, %v3154_v24 }
 0x4bf   : > { %v3191_v32 = vsel %vm3183_vm5, %v3179_v15, %v3187_v2  ;;  %vm3184_vm2 = vcmp.ge.f32.partialorder %v3180_v23, 0.0  ;;  %v3188_v35 = vmul.f32 0.2, %v3180_v23 }
 0x4c0   : > { %v3199_v37 = vadd.f32 %v3195_v18, %v3191_v32  ;;  %v3189_v20 = vsel %vm3181_vm6, %v3177_v19, %v3185_v22  ;;  %vm3182_vm8 = vcmp.ge.f32.partialorder %v3178_v31, 0.0  ;;  %v3186_v36 = vmul.f32 0.2, %v3178_v31 }
 0x4c1   : > { %v3197_v7 = vadd.f32 %v3193_v26, %v3189_v20  ;;  %v3192_v63 = vsel %vm3184_vm2, %v3180_v23, %v3188_v35 }
 0x4c2   : > { %3203 = vst.msk [vmem:[%s4612_s18 + $0x10] sm:$0xff] %vm841_vm15, %v3199_v37  ;;  %v3200_v42 = vadd.f32 %v3196_v33, %v3192_v63  ;;  %v3190_v27 = vsel %vm3182_vm8, %v3178_v31, %v3186_v36 }
 0x4c3   : > { %3201 = vst.msk [vmem:[%s4612_s18] sm:$0xff] %vm841_vm15, %v3197_v7  ;;  %v3198_v38 = vadd.f32 %v3194_v62, %v3190_v27 }
 0x4c4   : > { %3204 = vst.msk [vmem:[%s4612_s18 + $0x18] sm:$0xff] %vm841_vm15, %v3200_v42 }
 0x4c5   : > { %3202 = vst.msk [vmem:[%s4612_s18 + $0x8] sm:$0xff] %vm841_vm15, %v3198_v38 }
 0x4c6   : > { %4275 = shalt.err (!%p4272_p2)
}
 0x4c7   : > { %s4276_s18 = scalar_lea.hbm %s5317_s20, 512  ;;  %s4280_s19 = scalar_lea.hbm %s5390_s9, 2048 }
 0x4c8   : > { %p4277_p4 = scmp.ne.s32.totalorder %s5317_s20, %s4276_s18  ;;  %p4281_p7 = scmp.lt.u32.totalorder %s5317_s20, %s5390_s9 }
 0x4c9   : > { %p4282_p9 = scmp.lt.u32.totalorder %s4280_s19, %s4276_s18  ;;  %p4284_p11 = scmp.lt.u32.totalorder %s4276_s18, %s5317_s20 }
 0x4ca   : > { %p4278_p5 = pnand %p4277_p4, %p4467_p3 }
 0x4cb   : > { %p4283_p10 = por %p4282_p9, %p4281_p7 }
 0x4cc   : > { %p4279_p6 = pneg %p4278_p5 }
 0x4cd   : > { %p4285_p12 = por %p4284_p11, %p4283_p10 }
 0x4cf   : > { %p4286_p13 = pnand %p4285_p12, %p4279_p6 }
 0x4d1   : > { %4289 = shalt.err (!%p4286_p13)
}
 0x4d2   : > { %s4364_s15 = smov 128   ;;  %s4365_s27 = smov 8  }
 0x4d3   : > { %4106 = dma.vmem_to_hbm [thread:$0]  (%p4467_p3), %s5319_s14, 512, %s5317_s20, %s5329_s28, %s4364_s15, %s4364_s15, %s4365_s27  }
 0x4d4 PF: > { %p4112_p0 = scmp.ge.s32.totalorder %s4356_s16, 2  ;;  %s3236_s26 = sand.u32 1, %s4328_s30  }
 0x4d5   : > { %s3237_s21 = scalar_lea.sflag [#allocation5], %s3236_s26 }
 0x4d6   : > { %p4109_p1 = pnand %p4112_p0, %p4476_p8 }
 0x4d8   : > { %4323 = dma.done.wait (!%p4109_p1), %s3237_s21, 512  }
 0x4d9   : > { %4325 = vsyncadd (!%p4109_p1), %s3237_s21, 4294966784  ;;  %s22_s16 = sadd.s32 1, %s4356_s16   ;;  %s5425_s12 = sld [smem:[#allocation11_spill]] }
 0x4da   : > { %p19_p2 = scmp.ge.s32.totalorder %s22_s16, 6   ;;  %s5426_s17 = sld [smem:[#allocation7_spill]] }
 0x4db   : > { %s5427_s13 = sld [smem:[#allocation8_spill]]  ;;  %s5428_s14 = sld [smem:[#allocation9_spill]] }
 0x4dc   : > { %s5429_s15 = sld [smem:[#allocation10_spill]]  ;;  %s5430_s30 = smov %s4332_s10 }
 0x4dd   : > { %s5431_s10 = smov %s4336_s11  ;;  %21 = sbr.rel (!%p19_p2) target bundleno = 5 (0x5), region = 142 }
 0x4df   : > { %s5432_s11 = smov %s5425_s12 }
 0x4e0   : > { %s5433_s12 = smov %s5426_s17 }
 0x4e4   :  { %3242 = vsyncpa [#allocation5], 1 }
 0x4e5   :  { %3244 = vsyncpa [#allocation5 + $0x1], 1 }

</bundles_post_ra>
